<compile_context>
chip_gen: v6e
topology: v6e:2x2x1
jax: 0.10.0
libtpu: 0.0.40
codegen_flags: <defaults>
</compile_context>

<pallas_src>
import math

import jax
import jax.numpy as jnp
from jax import lax
from jax.experimental import pallas as pl
from jax.experimental.pallas import tpu as pltpu


def _vmem_budget_bytes():
    """~3/4 of physical VMEM; falls back to v7x's 64 MiB if the query fails."""
    try:
        cap = int(pltpu.get_tpu_info().vmem_capacity_bytes)
    except Exception:
        cap = 64 * 1024 * 1024
    return cap * 3 // 4


def _pick_time_block(T, B, H, vmem_budget, max_tb=32):
    """Time steps per grid iteration, capped so VMEM fits.

    Budget: double-buffered xproj (B,4H) + y (B,H) blocks per step, plus a
    single-buffered W_hh block and the h/c scratch.  T need not be divisible
    by the block (the wrapper pads + masks), so prime T no longer degrades
    to one grid step per time step.
    """
    per_step = (B * 4 * H + B * H) * 4 * 2          # f32, double-buffered
    fixed = H * 4 * H * 4 + 2 * B * H * 4           # W_hh (single-buf) + scratch
    tb = max(1, min(T, max_tb))
    while tb > 1 and fixed + tb * per_step > vmem_budget:
        tb -= 1
    return tb


def _reorder_gates_ifog(w):
    """PyTorch gate order [i, f, g, o] -> kernel order [i, f, o, g] (axis 0)."""
    H = w.shape[0] // 4
    return jnp.concatenate([w[:2 * H], w[3 * H:], w[2 * H:3 * H]], axis=0)


def _make_lstm_kernel(H, TB, seq_len, needs_mask, unroll):
    def kernel(xp_ref, whh_ref, y_ref, cn_ref, h_sc, c_sc):
        tb = pl.program_id(1)                      # time-block axis (inner)

        @pl.when(tb == 0)
        def _():
            h_sc[...] = jnp.zeros_like(h_sc)
            c_sc[...] = jnp.zeros_like(c_sc)

        def step(s, carry):
            h, c = carry
            # W_hh read inside the loop: regalloc is free to not pin it across
            # unrolled iterations at large H (avoids vld/vst spill slot).
            # TODO(synk): hold W_hh in MXU weight regs via matmul_push_rhs /
            # matmul_acc_lhs / matmul_pop; skipped because the tiny (B,H) tile
            # shapes here are not a safe fit for that explicit-MXU path.
            gates = xp_ref[s] + jnp.dot(h.astype(whh_ref.dtype), whh_ref[...],
                                        preferred_element_type=jnp.float32)
            # Gate order [i, f, o, g]: one sigmoid over 3H lanes + one tanh
            # per step (2 EUP pushes on the serial chain instead of 4).
            act = jax.nn.sigmoid(gates[:, :3 * H])
            i = act[:, 0 * H:1 * H]
            f = act[:, 1 * H:2 * H]
            o = act[:, 2 * H:3 * H]
            g = jnp.tanh(gates[:, 3 * H:])
            c_new = f * c + i * g
            h_new = o * jnp.tanh(c_new)
            if needs_mask:
                # Tail-pad steps (T padded up to a multiple of TB): freeze the
                # recurrent state; padded y rows are sliced off in the wrapper.
                m = ((tb * TB + s) < seq_len).astype(jnp.float32)
                h_out = h + m * (h_new - h)
                c_out = c + m * (c_new - c)
            else:
                h_out, c_out = h_new, c_new
            # TODO(synk): at H<128 this is a masked sub-vreg store; a truly
            # lane-dense y needs H padded to 128 or a larger fused last dim.
            y_ref[s] = h_new.astype(y_ref.dtype)
            return (h_out, c_out)

        h, c = lax.fori_loop(0, TB, step, (h_sc[...], c_sc[...]), unroll=unroll)
        h_sc[...] = h
        c_sc[...] = c

        # c_n is the only resident output (h_n == y[T-1], taken in the wrapper);
        # only the last time-block's write matters.
        @pl.when(tb == pl.num_programs(1) - 1)
        def _():
            cn_ref[...] = c.astype(cn_ref.dtype)

    return kernel


def lstm_layer_forward(x_tbd, w_ih_t, w_hh_t, bias, hidden_dim,
                       batch_blocks=1, max_time_block=32):
    """One LSTM layer.

    x_tbd : (T, B, D) f32 time-major inputs
    w_ih_t: (D, 4H) = reordered W_ih^T   (gate order [i, f, o, g])
    w_hh_t: (H, 4H) = reordered W_hh^T
    bias  : (1, 1, 4H) = reordered (b_ih + b_hh), f32
    Returns y: (T, B, H), h_n: (B, H), c_n: (B, H).
    """
    T, B, _ = x_tbd.shape
    H = hidden_dim

    if B % batch_blocks != 0:
        batch_blocks = 1
    BB = B // batch_blocks
    if batch_blocks > 1 and BB % 8 != 0:   # keep sublane alignment
        batch_blocks, BB = 1, B

    budget = _vmem_budget_bytes()
    TB = _pick_time_block(T, BB, H, budget, max_time_block)
    n_tb = pl.cdiv(T, TB)
    T_pad = n_tb * TB

    # cuDNN-style split: one big (T*B, D) @ (D, 4H) GEMM outside the recurrence.
    # (Default matmul precision on both kernel and reference; use
    # lax.Precision.HIGHEST here for strict fp32 PyTorch parity.)
    xproj = jnp.einsum("tbd,dg->tbg", x_tbd.astype(w_ih_t.dtype), w_ih_t,
                       preferred_element_type=jnp.float32) + bias
    if T_pad != T:
        xproj = jnp.pad(xproj, ((0, T_pad - T), (0, 0), (0, 0)))

    kernel = _make_lstm_kernel(H, TB, T, needs_mask=(T_pad != T),
                               unroll=min(TB, 8))

    def build_call(buffered_weights):
        w_kwargs = {"pipeline_mode": pl.Buffered(1)} if buffered_weights else {}
        grid_spec = pltpu.PrefetchScalarGridSpec(
            num_scalar_prefetch=0,
            grid=(batch_blocks, n_tb),
            in_specs=[
                pl.BlockSpec((TB, BB, 4 * H), lambda b, t: (t, b, 0)),
                # Constant-index weight block; single-buffered (never refetched).
                pl.BlockSpec((H, 4 * H), lambda b, t: (0, 0), **w_kwargs),
            ],
            out_specs=[
                pl.BlockSpec((TB, BB, H), lambda b, t: (t, b, 0)),
                pl.BlockSpec((BB, H), lambda b, t: (b, 0)),
            ],
            scratch_shapes=[
                pltpu.VMEM((BB, H), jnp.float32),
                pltpu.VMEM((BB, H), jnp.float32),
            ],
        )
        return pl.pallas_call(
            kernel,
            out_shape=(
                jax.ShapeDtypeStruct((T_pad, B, H), jnp.float32),
                jax.ShapeDtypeStruct((B, H), jnp.float32),
            ),
            grid_spec=grid_spec,
            compiler_params=pltpu.CompilerParams(
                dimension_semantics=("parallel", "arbitrary"),
                vmem_limit_bytes=budget),
        )

    try:
        y, c_n = build_call(True)(xproj, w_hh_t)
    except Exception:
        # Fallback if Buffered(1) is unsupported in this Pallas build.
        y, c_n = build_call(False)(xproj, w_hh_t)

    y = y[:T]
    h_n = y[T - 1]                    # h_n is redundant with the last y row
    return y, h_n, c_n


class EncoderRNNPallas:
    """Pallas equivalent of EncoderRNN: output, (h_n, c_n) = lstm(input)."""

    def __init__(self, input_size, hidden_size, hidden_dim, num_layers, key,
                 matmul_dtype=jnp.float32, batch_blocks=1):
        # matmul_dtype=jnp.bfloat16 is recommended on v6e/v7x at production
        # sizes (loosens parity to ~1e-2); f32 kept here for strict parity.
        # batch_blocks>1 (B multiple of 16) shards the batch grid axis across
        # v7x's two TensorCores.
        self.input_size = input_size
        self.hidden_size = hidden_size      # stored but unused, as in the module
        self.hidden_dim = hidden_dim
        self.num_layers = num_layers
        self.batch_blocks = batch_blocks

        k = 1.0 / math.sqrt(hidden_dim)
        keys = jax.random.split(key, num_layers * 4)
        self.params = []          # PyTorch layout (for the reference check)
        self.kernel_params = []   # reordered + transposed once, not per forward
        for layer in range(num_layers):
            in_dim = input_size if layer == 0 else hidden_dim
            w_ih = jax.random.uniform(keys[4 * layer + 0],
                                      (4 * hidden_dim, in_dim), jnp.float32, -k, k)
            w_hh = jax.random.uniform(keys[4 * layer + 1],
                                      (4 * hidden_dim, hidden_dim), jnp.float32, -k, k)
            b_ih = jax.random.uniform(keys[4 * layer + 2],
                                      (4 * hidden_dim,), jnp.float32, -k, k)
            b_hh = jax.random.uniform(keys[4 * layer + 3],
                                      (4 * hidden_dim,), jnp.float32, -k, k)
            self.params.append((w_ih, w_hh, b_ih, b_hh))
            self.kernel_params.append((
                jnp.asarray(_reorder_gates_ifog(w_ih).T).astype(matmul_dtype),  # (D, 4H)
                jnp.asarray(_reorder_gates_ifog(w_hh).T).astype(matmul_dtype),  # (H, 4H)
                _reorder_gates_ifog(b_ih + b_hh).reshape(1, 1, 4 * hidden_dim), # (1,1,4H) f32
            ))

    def __call__(self, x_btd):
        # x_btd: (B, T, input_size), batch_first like nn.LSTM(batch_first=True)
        x = jnp.transpose(x_btd, (1, 0, 2))          # time-major (T, B, D)
        hs, cs = [], []
        for (w_ih_t, w_hh_t, bias) in self.kernel_params:
            x, h_n, c_n = lstm_layer_forward(x, w_ih_t, w_hh_t, bias,
                                             self.hidden_dim,
                                             batch_blocks=self.batch_blocks)
            hs.append(h_n)
            cs.append(c_n)
        output = jnp.transpose(x, (1, 0, 2))         # (B, T, H)
        h_n = jnp.stack(hs, axis=0)                  # (num_layers, B, H)
        c_n = jnp.stack(cs, axis=0)                  # (num_layers, B, H)
        return output, (h_n, c_n)


def _lstm_reference(x_btd, params, hidden_dim):
    """Pure-JAX reference matching torch.nn.LSTM semantics (PyTorch gate order)."""
    B = x_btd.shape[0]
    x = x_btd
    hs, cs = [], []
    for (w_ih, w_hh, b_ih, b_hh) in params:
        def step(carry, xt, w_ih=w_ih, w_hh=w_hh, b_ih=b_ih, b_hh=b_hh):
            h, c = carry
            gates = xt @ w_ih.T + h @ w_hh.T + b_ih + b_hh
            i, f, g, o = jnp.split(gates, 4, axis=-1)
            i = jax.nn.sigmoid(i)
            f = jax.nn.sigmoid(f)
            g = jnp.tanh(g)
            o = jax.nn.sigmoid(o)
            c = f * c + i * g
            h = o * jnp.tanh(c)
            return (h, c), h

        h0 = jnp.zeros((B, hidden_dim), jnp.float32)
        c0 = jnp.zeros((B, hidden_dim), jnp.float32)
        (hT, cT), ys = jax.lax.scan(step, (h0, c0), jnp.transpose(x, (1, 0, 2)))
        x = jnp.transpose(ys, (1, 0, 2))
        hs.append(hT)
        cs.append(cT)
    return x, (jnp.stack(hs), jnp.stack(cs))


if __name__ == "__main__":
    B, T = 2, 8
    input_size, hidden_size, hidden_dim, num_layers = 16, 64, 32, 2

    key = jax.random.PRNGKey(0)
    k_param, k_input = jax.random.split(key)

    model = EncoderRNNPallas(input_size, hidden_size, hidden_dim, num_layers,
                             k_param)
    x = jax.random.normal(k_input, (B, T, input_size), jnp.float32)

    output, (h_n, c_n) = model(x)
    output = jax.block_until_ready(output)
    h_n = jax.block_until_ready(h_n)
    c_n = jax.block_until_ready(c_n)

    # Sanity check against pure-JAX reference.
    out_ref, (h_ref, c_ref) = _lstm_reference(x, model.params, hidden_dim)
    assert output.shape == (B, T, hidden_dim)
    assert h_n.shape == (num_layers, B, hidden_dim)
    assert c_n.shape == (num_layers, B, hidden_dim)
    assert jnp.allclose(output, out_ref, atol=1e-4, rtol=1e-4)
    assert jnp.allclose(h_n, h_ref, atol=1e-4, rtol=1e-4)
    assert jnp.allclose(c_n, c_ref, atol=1e-4, rtol=1e-4)

    print("KERNEL_OK")
</pallas_src>

<mosaic_0001>
module attributes {stable_mosaic.version = 11 : i64} {
  func.func @kernel(%arg0: i32, %arg1: i32, %arg2: memref<8x2x128xf32, #tpu.memory_space<vmem>>, %arg3: memref<32x128xf32, #tpu.memory_space<vmem>>, %arg4: memref<8x2x32xf32, #tpu.memory_space<vmem>>, %arg5: memref<2x32xf32, #tpu.memory_space<vmem>>, %arg6: memref<2x32xf32, #tpu.memory_space<vmem>>, %arg7: memref<2x32xf32, #tpu.memory_space<vmem>>) attributes {dimension_semantics = [#tpu.dimension_semantics<parallel>, #tpu.dimension_semantics<arbitrary>], iteration_bounds = array<i64: 1, 1>, scalar_prefetch = 0 : i64, scratch_operands = 2 : i64, tpu.core_type = #tpu.core_type<tc>, window_params = [{transform_indices = @transform_0, window_bounds = array<i64: 8, 2, 128>}, {pipeline_mode = #tpu.pipeline_mode<synchronous>, transform_indices = @transform_1, window_bounds = array<i64: 32, 128>}, {transform_indices = @transform_2, window_bounds = array<i64: 8, 2, 32>}, {transform_indices = @transform_3, window_bounds = array<i64: 2, 32>}]} {
    %c0_i32 = arith.constant 0 : i32
    %0 = arith.cmpi eq, %arg1, %c0_i32 : i32
    %1 = arith.extui %0 : i1 to i32
    %c0_i32_0 = arith.constant 0 : i32
    %2 = arith.cmpi ne, %1, %c0_i32_0 : i32
    scf.if %2 {
      %cst_74 = arith.constant 0.000000e+00 : f32
      %218 = vector.broadcast %cst_74 : f32 to vector<2x32xf32>
      %c0_75 = arith.constant 0 : index
      %c0_76 = arith.constant 0 : index
      %219 = vector.load %arg6[%c0_75, %c0_76] : memref<2x32xf32, #tpu.memory_space<vmem>>, vector<2x32xf32>
      tpu.vector_store %arg6[%c0_75, %c0_76], %218 {strides = array<i32>} : memref<2x32xf32, #tpu.memory_space<vmem>>, vector<2x32xf32>,
      %cst_77 = arith.constant 0.000000e+00 : f32
      %220 = vector.broadcast %cst_77 : f32 to vector<2x32xf32>
      %c0_78 = arith.constant 0 : index
      %c0_79 = arith.constant 0 : index
      %221 = vector.load %arg7[%c0_78, %c0_79] : memref<2x32xf32, #tpu.memory_space<vmem>>, vector<2x32xf32>
      tpu.vector_store %arg7[%c0_78, %c0_79], %220 {strides = array<i32>} : memref<2x32xf32, #tpu.memory_space<vmem>>, vector<2x32xf32>,
    } else {
    }
    %c0 = arith.constant 0 : index
    %c0_1 = arith.constant 0 : index
    %3 = vector.load %arg6[%c0, %c0_1] : memref<2x32xf32, #tpu.memory_space<vmem>>, vector<2x32xf32>
    %c0_2 = arith.constant 0 : index
    %c0_3 = arith.constant 0 : index
    %4 = vector.load %arg7[%c0_2, %c0_3] : memref<2x32xf32, #tpu.memory_space<vmem>>, vector<2x32xf32>
    %c0_i32_4 = arith.constant 0 : i32
    %5 = arith.index_cast %c0_i32_4 : i32 to index
    %c0_5 = arith.constant 0 : index
    %c0_6 = arith.constant 0 : index
    %6 = vector.load %arg2[%5, %c0_5, %c0_6] : memref<8x2x128xf32, #tpu.memory_space<vmem>>, vector<1x2x128xf32>
    %7 = vector.shape_cast %6 : vector<1x2x128xf32> to vector<2x128xf32>
    %c0_7 = arith.constant 0 : index
    %c0_8 = arith.constant 0 : index
    %8 = vector.load %arg3[%c0_7, %c0_8] : memref<32x128xf32, #tpu.memory_space<vmem>>, vector<32x128xf32>
    %cst = arith.constant dense<0.000000e+00> : vector<2x128xf32>
    %9 = tpu.matmul %3, %8, %cst {dimension_numbers = #tpu.dot_dimension_numbers<[1], [0], [0], [1], [0, 0, 1, 1], [], []>} : vector<2x32xf32>, vector<32x128xf32>, vector<2x128xf32> -> vector<2x128xf32>
    %10 = arith.addf %7, %9 : vector<2x128xf32>
    %11 = vector.extract_strided_slice %10 {offsets = [0, 0], sizes = [2, 96], strides = [1, 1]} : vector<2x128xf32> to vector<2x96xf32>
    %12 = arith.negf %11 : vector<2x96xf32>
    %13 = math.exp %12 : vector<2x96xf32>
    %cst_9 = arith.constant 1.000000e+00 : f32
    %14 = vector.broadcast %cst_9 : f32 to vector<2x96xf32>
    %15 = arith.addf %14, %13 : vector<2x96xf32>
    %16 = arith.divf %14, %15 : vector<2x96xf32>
    %17 = vector.extract_strided_slice %16 {offsets = [0, 0], sizes = [2, 32], strides = [1, 1]} : vector<2x96xf32> to vector<2x32xf32>
    %18 = vector.extract_strided_slice %16 {offsets = [0, 32], sizes = [2, 32], strides = [1, 1]} : vector<2x96xf32> to vector<2x32xf32>
    %19 = vector.extract_strided_slice %16 {offsets = [0, 64], sizes = [2, 32], strides = [1, 1]} : vector<2x96xf32> to vector<2x32xf32>
    %20 = vector.extract_strided_slice %10 {offsets = [0, 96], sizes = [2, 32], strides = [1, 1]} : vector<2x128xf32> to vector<2x32xf32>
    %21 = math.tanh %20 : vector<2x32xf32>
    %22 = arith.mulf %18, %4 : vector<2x32xf32>
    %23 = arith.mulf %17, %21 : vector<2x32xf32>
    %24 = arith.addf %22, %23 : vector<2x32xf32>
    %25 = math.tanh %24 : vector<2x32xf32>
    %26 = arith.mulf %19, %25 : vector<2x32xf32>
    %27 = arith.index_cast %c0_i32_4 : i32 to index
    %c0_10 = arith.constant 0 : index
    %c0_11 = arith.constant 0 : index
    %28 = vector.load %arg4[%27, %c0_10, %c0_11] : memref<8x2x32xf32, #tpu.memory_space<vmem>>, vector<1x2x32xf32>
    %29 = vector.shape_cast %28 : vector<1x2x32xf32> to vector<2x32xf32>
    %30 = vector.shape_cast %26 : vector<2x32xf32> to vector<1x2x32xf32>
    tpu.vector_store %arg4[%27, %c0_10, %c0_11], %30 {strides = array<i32>} : memref<8x2x32xf32, #tpu.memory_space<vmem>>, vector<1x2x32xf32>,
    %c1_i32 = arith.constant 1 : i32
    %31 = arith.index_cast %c1_i32 : i32 to index
    %c0_12 = arith.constant 0 : index
    %c0_13 = arith.constant 0 : index
    %32 = vector.load %arg2[%31, %c0_12, %c0_13] : memref<8x2x128xf32, #tpu.memory_space<vmem>>, vector<1x2x128xf32>
    %33 = vector.shape_cast %32 : vector<1x2x128xf32> to vector<2x128xf32>
    %c0_14 = arith.constant 0 : index
    %c0_15 = arith.constant 0 : index
    %34 = vector.load %arg3[%c0_14, %c0_15] : memref<32x128xf32, #tpu.memory_space<vmem>>, vector<32x128xf32>
    %cst_16 = arith.constant dense<0.000000e+00> : vector<2x128xf32>
    %35 = tpu.matmul %26, %34, %cst_16 {dimension_numbers = #tpu.dot_dimension_numbers<[1], [0], [0], [1], [0, 0, 1, 1], [], []>} : vector<2x32xf32>, vector<32x128xf32>, vector<2x128xf32> -> vector<2x128xf32>
    %36 = arith.addf %33, %35 : vector<2x128xf32>
    %37 = vector.extract_strided_slice %36 {offsets = [0, 0], sizes = [2, 96], strides = [1, 1]} : vector<2x128xf32> to vector<2x96xf32>
    %38 = arith.negf %37 : vector<2x96xf32>
    %39 = math.exp %38 : vector<2x96xf32>
    %cst_17 = arith.constant 1.000000e+00 : f32
    %40 = vector.broadcast %cst_17 : f32 to vector<2x96xf32>
    %41 = arith.addf %40, %39 : vector<2x96xf32>
    %42 = arith.divf %40, %41 : vector<2x96xf32>
    %43 = vector.extract_strided_slice %42 {offsets = [0, 0], sizes = [2, 32], strides = [1, 1]} : vector<2x96xf32> to vector<2x32xf32>
    %44 = vector.extract_strided_slice %42 {offsets = [0, 32], sizes = [2, 32], strides = [1, 1]} : vector<2x96xf32> to vector<2x32xf32>
    %45 = vector.extract_strided_slice %42 {offsets = [0, 64], sizes = [2, 32], strides = [1, 1]} : vector<2x96xf32> to vector<2x32xf32>
    %46 = vector.extract_strided_slice %36 {offsets = [0, 96], sizes = [2, 32], strides = [1, 1]} : vector<2x128xf32> to vector<2x32xf32>
    %47 = math.tanh %46 : vector<2x32xf32>
    %48 = arith.mulf %44, %24 : vector<2x32xf32>
    %49 = arith.mulf %43, %47 : vector<2x32xf32>
    %50 = arith.addf %48, %49 : vector<2x32xf32>
    %51 = math.tanh %50 : vector<2x32xf32>
    %52 = arith.mulf %45, %51 : vector<2x32xf32>
    %53 = arith.index_cast %c1_i32 : i32 to index
    %c0_18 = arith.constant 0 : index
    %c0_19 = arith.constant 0 : index
    %54 = vector.load %arg4[%53, %c0_18, %c0_19] : memref<8x2x32xf32, #tpu.memory_space<vmem>>, vector<1x2x32xf32>
    %55 = vector.shape_cast %54 : vector<1x2x32xf32> to vector<2x32xf32>
    %56 = vector.shape_cast %52 : vector<2x32xf32> to vector<1x2x32xf32>
    tpu.vector_store %arg4[%53, %c0_18, %c0_19], %56 {strides = array<i32>} : memref<8x2x32xf32, #tpu.memory_space<vmem>>, vector<1x2x32xf32>,
    %c2_i32 = arith.constant 2 : i32
    %57 = arith.index_cast %c2_i32 : i32 to index
    %c0_20 = arith.constant 0 : index
    %c0_21 = arith.constant 0 : index
    %58 = vector.load %arg2[%57, %c0_20, %c0_21] : memref<8x2x128xf32, #tpu.memory_space<vmem>>, vector<1x2x128xf32>
    %59 = vector.shape_cast %58 : vector<1x2x128xf32> to vector<2x128xf32>
    %c0_22 = arith.constant 0 : index
    %c0_23 = arith.constant 0 : index
    %60 = vector.load %arg3[%c0_22, %c0_23] : memref<32x128xf32, #tpu.memory_space<vmem>>, vector<32x128xf32>
    %cst_24 = arith.constant dense<0.000000e+00> : vector<2x128xf32>
    %61 = tpu.matmul %52, %60, %cst_24 {dimension_numbers = #tpu.dot_dimension_numbers<[1], [0], [0], [1], [0, 0, 1, 1], [], []>} : vector<2x32xf32>, vector<32x128xf32>, vector<2x128xf32> -> vector<2x128xf32>
    %62 = arith.addf %59, %61 : vector<2x128xf32>
    %63 = vector.extract_strided_slice %62 {offsets = [0, 0], sizes = [2, 96], strides = [1, 1]} : vector<2x128xf32> to vector<2x96xf32>
    %64 = arith.negf %63 : vector<2x96xf32>
    %65 = math.exp %64 : vector<2x96xf32>
    %cst_25 = arith.constant 1.000000e+00 : f32
    %66 = vector.broadcast %cst_25 : f32 to vector<2x96xf32>
    %67 = arith.addf %66, %65 : vector<2x96xf32>
    %68 = arith.divf %66, %67 : vector<2x96xf32>
    %69 = vector.extract_strided_slice %68 {offsets = [0, 0], sizes = [2, 32], strides = [1, 1]} : vector<2x96xf32> to vector<2x32xf32>
    %70 = vector.extract_strided_slice %68 {offsets = [0, 32], sizes = [2, 32], strides = [1, 1]} : vector<2x96xf32> to vector<2x32xf32>
    %71 = vector.extract_strided_slice %68 {offsets = [0, 64], sizes = [2, 32], strides = [1, 1]} : vector<2x96xf32> to vector<2x32xf32>
    %72 = vector.extract_strided_slice %62 {offsets = [0, 96], sizes = [2, 32], strides = [1, 1]} : vector<2x128xf32> to vector<2x32xf32>
    %73 = math.tanh %72 : vector<2x32xf32>
    %74 = arith.mulf %70, %50 : vector<2x32xf32>
    %75 = arith.mulf %69, %73 : vector<2x32xf32>
    %76 = arith.addf %74, %75 : vector<2x32xf32>
    %77 = math.tanh %76 : vector<2x32xf32>
    %78 = arith.mulf %71, %77 : vector<2x32xf32>
    %79 = arith.index_cast %c2_i32 : i32 to index
    %c0_26 = arith.constant 0 : index
    %c0_27 = arith.constant 0 : index
    %80 = vector.load %arg4[%79, %c0_26, %c0_27] : memref<8x2x32xf32, #tpu.memory_space<vmem>>, vector<1x2x32xf32>
    %81 = vector.shape_cast %80 : vector<1x2x32xf32> to vector<2x32xf32>
    %82 = vector.shape_cast %78 : vector<2x32xf32> to vector<1x2x32xf32>
    tpu.vector_store %arg4[%79, %c0_26, %c0_27], %82 {strides = array<i32>} : memref<8x2x32xf32, #tpu.memory_space<vmem>>, vector<1x2x32xf32>,
    %c3_i32 = arith.constant 3 : i32
    %83 = arith.index_cast %c3_i32 : i32 to index
    %c0_28 = arith.constant 0 : index
    %c0_29 = arith.constant 0 : index
    %84 = vector.load %arg2[%83, %c0_28, %c0_29] : memref<8x2x128xf32, #tpu.memory_space<vmem>>, vector<1x2x128xf32>
    %85 = vector.shape_cast %84 : vector<1x2x128xf32> to vector<2x128xf32>
    %c0_30 = arith.constant 0 : index
    %c0_31 = arith.constant 0 : index
    %86 = vector.load %arg3[%c0_30, %c0_31] : memref<32x128xf32, #tpu.memory_space<vmem>>, vector<32x128xf32>
    %cst_32 = arith.constant dense<0.000000e+00> : vector<2x128xf32>
    %87 = tpu.matmul %78, %86, %cst_32 {dimension_numbers = #tpu.dot_dimension_numbers<[1], [0], [0], [1], [0, 0, 1, 1], [], []>} : vector<2x32xf32>, vector<32x128xf32>, vector<2x128xf32> -> vector<2x128xf32>
    %88 = arith.addf %85, %87 : vector<2x128xf32>
    %89 = vector.extract_strided_slice %88 {offsets = [0, 0], sizes = [2, 96], strides = [1, 1]} : vector<2x128xf32> to vector<2x96xf32>
    %90 = arith.negf %89 : vector<2x96xf32>
    %91 = math.exp %90 : vector<2x96xf32>
    %cst_33 = arith.constant 1.000000e+00 : f32
    %92 = vector.broadcast %cst_33 : f32 to vector<2x96xf32>
    %93 = arith.addf %92, %91 : vector<2x96xf32>
    %94 = arith.divf %92, %93 : vector<2x96xf32>
    %95 = vector.extract_strided_slice %94 {offsets = [0, 0], sizes = [2, 32], strides = [1, 1]} : vector<2x96xf32> to vector<2x32xf32>
    %96 = vector.extract_strided_slice %94 {offsets = [0, 32], sizes = [2, 32], strides = [1, 1]} : vector<2x96xf32> to vector<2x32xf32>
    %97 = vector.extract_strided_slice %94 {offsets = [0, 64], sizes = [2, 32], strides = [1, 1]} : vector<2x96xf32> to vector<2x32xf32>
    %98 = vector.extract_strided_slice %88 {offsets = [0, 96], sizes = [2, 32], strides = [1, 1]} : vector<2x128xf32> to vector<2x32xf32>
    %99 = math.tanh %98 : vector<2x32xf32>
    %100 = arith.mulf %96, %76 : vector<2x32xf32>
    %101 = arith.mulf %95, %99 : vector<2x32xf32>
    %102 = arith.addf %100, %101 : vector<2x32xf32>
    %103 = math.tanh %102 : vector<2x32xf32>
    %104 = arith.mulf %97, %103 : vector<2x32xf32>
    %105 = arith.index_cast %c3_i32 : i32 to index
    %c0_34 = arith.constant 0 : index
    %c0_35 = arith.constant 0 : index
    %106 = vector.load %arg4[%105, %c0_34, %c0_35] : memref<8x2x32xf32, #tpu.memory_space<vmem>>, vector<1x2x32xf32>
    %107 = vector.shape_cast %106 : vector<1x2x32xf32> to vector<2x32xf32>
    %108 = vector.shape_cast %104 : vector<2x32xf32> to vector<1x2x32xf32>
    tpu.vector_store %arg4[%105, %c0_34, %c0_35], %108 {strides = array<i32>} : memref<8x2x32xf32, #tpu.memory_space<vmem>>, vector<1x2x32xf32>,
    %c4_i32 = arith.constant 4 : i32
    %109 = arith.index_cast %c4_i32 : i32 to index
    %c0_36 = arith.constant 0 : index
    %c0_37 = arith.constant 0 : index
    %110 = vector.load %arg2[%109, %c0_36, %c0_37] : memref<8x2x128xf32, #tpu.memory_space<vmem>>, vector<1x2x128xf32>
    %111 = vector.shape_cast %110 : vector<1x2x128xf32> to vector<2x128xf32>
    %c0_38 = arith.constant 0 : index
    %c0_39 = arith.constant 0 : index
    %112 = vector.load %arg3[%c0_38, %c0_39] : memref<32x128xf32, #tpu.memory_space<vmem>>, vector<32x128xf32>
    %cst_40 = arith.constant dense<0.000000e+00> : vector<2x128xf32>
    %113 = tpu.matmul %104, %112, %cst_40 {dimension_numbers = #tpu.dot_dimension_numbers<[1], [0], [0], [1], [0, 0, 1, 1], [], []>} : vector<2x32xf32>, vector<32x128xf32>, vector<2x128xf32> -> vector<2x128xf32>
    %114 = arith.addf %111, %113 : vector<2x128xf32>
    %115 = vector.extract_strided_slice %114 {offsets = [0, 0], sizes = [2, 96], strides = [1, 1]} : vector<2x128xf32> to vector<2x96xf32>
    %116 = arith.negf %115 : vector<2x96xf32>
    %117 = math.exp %116 : vector<2x96xf32>
    %cst_41 = arith.constant 1.000000e+00 : f32
    %118 = vector.broadcast %cst_41 : f32 to vector<2x96xf32>
    %119 = arith.addf %118, %117 : vector<2x96xf32>
    %120 = arith.divf %118, %119 : vector<2x96xf32>
    %121 = vector.extract_strided_slice %120 {offsets = [0, 0], sizes = [2, 32], strides = [1, 1]} : vector<2x96xf32> to vector<2x32xf32>
    %122 = vector.extract_strided_slice %120 {offsets = [0, 32], sizes = [2, 32], strides = [1, 1]} : vector<2x96xf32> to vector<2x32xf32>
    %123 = vector.extract_strided_slice %120 {offsets = [0, 64], sizes = [2, 32], strides = [1, 1]} : vector<2x96xf32> to vector<2x32xf32>
    %124 = vector.extract_strided_slice %114 {offsets = [0, 96], sizes = [2, 32], strides = [1, 1]} : vector<2x128xf32> to vector<2x32xf32>
    %125 = math.tanh %124 : vector<2x32xf32>
    %126 = arith.mulf %122, %102 : vector<2x32xf32>
    %127 = arith.mulf %121, %125 : vector<2x32xf32>
    %128 = arith.addf %126, %127 : vector<2x32xf32>
    %129 = math.tanh %128 : vector<2x32xf32>
    %130 = arith.mulf %123, %129 : vector<2x32xf32>
    %131 = arith.index_cast %c4_i32 : i32 to index
    %c0_42 = arith.constant 0 : index
    %c0_43 = arith.constant 0 : index
    %132 = vector.load %arg4[%131, %c0_42, %c0_43] : memref<8x2x32xf32, #tpu.memory_space<vmem>>, vector<1x2x32xf32>
    %133 = vector.shape_cast %132 : vector<1x2x32xf32> to vector<2x32xf32>
    %134 = vector.shape_cast %130 : vector<2x32xf32> to vector<1x2x32xf32>
    tpu.vector_store %arg4[%131, %c0_42, %c0_43], %134 {strides = array<i32>} : memref<8x2x32xf32, #tpu.memory_space<vmem>>, vector<1x2x32xf32>,
    %c5_i32 = arith.constant 5 : i32
    %135 = arith.index_cast %c5_i32 : i32 to index
    %c0_44 = arith.constant 0 : index
    %c0_45 = arith.constant 0 : index
    %136 = vector.load %arg2[%135, %c0_44, %c0_45] : memref<8x2x128xf32, #tpu.memory_space<vmem>>, vector<1x2x128xf32>
    %137 = vector.shape_cast %136 : vector<1x2x128xf32> to vector<2x128xf32>
    %c0_46 = arith.constant 0 : index
    %c0_47 = arith.constant 0 : index
    %138 = vector.load %arg3[%c0_46, %c0_47] : memref<32x128xf32, #tpu.memory_space<vmem>>, vector<32x128xf32>
    %cst_48 = arith.constant dense<0.000000e+00> : vector<2x128xf32>
    %139 = tpu.matmul %130, %138, %cst_48 {dimension_numbers = #tpu.dot_dimension_numbers<[1], [0], [0], [1], [0, 0, 1, 1], [], []>} : vector<2x32xf32>, vector<32x128xf32>, vector<2x128xf32> -> vector<2x128xf32>
    %140 = arith.addf %137, %139 : vector<2x128xf32>
    %141 = vector.extract_strided_slice %140 {offsets = [0, 0], sizes = [2, 96], strides = [1, 1]} : vector<2x128xf32> to vector<2x96xf32>
    %142 = arith.negf %141 : vector<2x96xf32>
    %143 = math.exp %142 : vector<2x96xf32>
    %cst_49 = arith.constant 1.000000e+00 : f32
    %144 = vector.broadcast %cst_49 : f32 to vector<2x96xf32>
    %145 = arith.addf %144, %143 : vector<2x96xf32>
    %146 = arith.divf %144, %145 : vector<2x96xf32>
    %147 = vector.extract_strided_slice %146 {offsets = [0, 0], sizes = [2, 32], strides = [1, 1]} : vector<2x96xf32> to vector<2x32xf32>
    %148 = vector.extract_strided_slice %146 {offsets = [0, 32], sizes = [2, 32], strides = [1, 1]} : vector<2x96xf32> to vector<2x32xf32>
    %149 = vector.extract_strided_slice %146 {offsets = [0, 64], sizes = [2, 32], strides = [1, 1]} : vector<2x96xf32> to vector<2x32xf32>
    %150 = vector.extract_strided_slice %140 {offsets = [0, 96], sizes = [2, 32], strides = [1, 1]} : vector<2x128xf32> to vector<2x32xf32>
    %151 = math.tanh %150 : vector<2x32xf32>
    %152 = arith.mulf %148, %128 : vector<2x32xf32>
    %153 = arith.mulf %147, %151 : vector<2x32xf32>
    %154 = arith.addf %152, %153 : vector<2x32xf32>
    %155 = math.tanh %154 : vector<2x32xf32>
    %156 = arith.mulf %149, %155 : vector<2x32xf32>
    %157 = arith.index_cast %c5_i32 : i32 to index
    %c0_50 = arith.constant 0 : index
    %c0_51 = arith.constant 0 : index
    %158 = vector.load %arg4[%157, %c0_50, %c0_51] : memref<8x2x32xf32, #tpu.memory_space<vmem>>, vector<1x2x32xf32>
    %159 = vector.shape_cast %158 : vector<1x2x32xf32> to vector<2x32xf32>
    %160 = vector.shape_cast %156 : vector<2x32xf32> to vector<1x2x32xf32>
    tpu.vector_store %arg4[%157, %c0_50, %c0_51], %160 {strides = array<i32>} : memref<8x2x32xf32, #tpu.memory_space<vmem>>, vector<1x2x32xf32>,
    %c6_i32 = arith.constant 6 : i32
    %161 = arith.index_cast %c6_i32 : i32 to index
    %c0_52 = arith.constant 0 : index
    %c0_53 = arith.constant 0 : index
    %162 = vector.load %arg2[%161, %c0_52, %c0_53] : memref<8x2x128xf32, #tpu.memory_space<vmem>>, vector<1x2x128xf32>
    %163 = vector.shape_cast %162 : vector<1x2x128xf32> to vector<2x128xf32>
    %c0_54 = arith.constant 0 : index
    %c0_55 = arith.constant 0 : index
    %164 = vector.load %arg3[%c0_54, %c0_55] : memref<32x128xf32, #tpu.memory_space<vmem>>, vector<32x128xf32>
    %cst_56 = arith.constant dense<0.000000e+00> : vector<2x128xf32>
    %165 = tpu.matmul %156, %164, %cst_56 {dimension_numbers = #tpu.dot_dimension_numbers<[1], [0], [0], [1], [0, 0, 1, 1], [], []>} : vector<2x32xf32>, vector<32x128xf32>, vector<2x128xf32> -> vector<2x128xf32>
    %166 = arith.addf %163, %165 : vector<2x128xf32>
    %167 = vector.extract_strided_slice %166 {offsets = [0, 0], sizes = [2, 96], strides = [1, 1]} : vector<2x128xf32> to vector<2x96xf32>
    %168 = arith.negf %167 : vector<2x96xf32>
    %169 = math.exp %168 : vector<2x96xf32>
    %cst_57 = arith.constant 1.000000e+00 : f32
    %170 = vector.broadcast %cst_57 : f32 to vector<2x96xf32>
    %171 = arith.addf %170, %169 : vector<2x96xf32>
    %172 = arith.divf %170, %171 : vector<2x96xf32>
    %173 = vector.extract_strided_slice %172 {offsets = [0, 0], sizes = [2, 32], strides = [1, 1]} : vector<2x96xf32> to vector<2x32xf32>
    %174 = vector.extract_strided_slice %172 {offsets = [0, 32], sizes = [2, 32], strides = [1, 1]} : vector<2x96xf32> to vector<2x32xf32>
    %175 = vector.extract_strided_slice %172 {offsets = [0, 64], sizes = [2, 32], strides = [1, 1]} : vector<2x96xf32> to vector<2x32xf32>
    %176 = vector.extract_strided_slice %166 {offsets = [0, 96], sizes = [2, 32], strides = [1, 1]} : vector<2x128xf32> to vector<2x32xf32>
    %177 = math.tanh %176 : vector<2x32xf32>
    %178 = arith.mulf %174, %154 : vector<2x32xf32>
    %179 = arith.mulf %173, %177 : vector<2x32xf32>
    %180 = arith.addf %178, %179 : vector<2x32xf32>
    %181 = math.tanh %180 : vector<2x32xf32>
    %182 = arith.mulf %175, %181 : vector<2x32xf32>
    %183 = arith.index_cast %c6_i32 : i32 to index
    %c0_58 = arith.constant 0 : index
    %c0_59 = arith.constant 0 : index
    %184 = vector.load %arg4[%183, %c0_58, %c0_59] : memref<8x2x32xf32, #tpu.memory_space<vmem>>, vector<1x2x32xf32>
    %185 = vector.shape_cast %184 : vector<1x2x32xf32> to vector<2x32xf32>
    %186 = vector.shape_cast %182 : vector<2x32xf32> to vector<1x2x32xf32>
    tpu.vector_store %arg4[%183, %c0_58, %c0_59], %186 {strides = array<i32>} : memref<8x2x32xf32, #tpu.memory_space<vmem>>, vector<1x2x32xf32>,
    %c7_i32 = arith.constant 7 : i32
    %187 = arith.index_cast %c7_i32 : i32 to index
    %c0_60 = arith.constant 0 : index
    %c0_61 = arith.constant 0 : index
    %188 = vector.load %arg2[%187, %c0_60, %c0_61] : memref<8x2x128xf32, #tpu.memory_space<vmem>>, vector<1x2x128xf32>
    %189 = vector.shape_cast %188 : vector<1x2x128xf32> to vector<2x128xf32>
    %c0_62 = arith.constant 0 : index
    %c0_63 = arith.constant 0 : index
    %190 = vector.load %arg3[%c0_62, %c0_63] : memref<32x128xf32, #tpu.memory_space<vmem>>, vector<32x128xf32>
    %cst_64 = arith.constant dense<0.000000e+00> : vector<2x128xf32>
    %191 = tpu.matmul %182, %190, %cst_64 {dimension_numbers = #tpu.dot_dimension_numbers<[1], [0], [0], [1], [0, 0, 1, 1], [], []>} : vector<2x32xf32>, vector<32x128xf32>, vector<2x128xf32> -> vector<2x128xf32>
    %192 = arith.addf %189, %191 : vector<2x128xf32>
    %193 = vector.extract_strided_slice %192 {offsets = [0, 0], sizes = [2, 96], strides = [1, 1]} : vector<2x128xf32> to vector<2x96xf32>
    %194 = arith.negf %193 : vector<2x96xf32>
    %195 = math.exp %194 : vector<2x96xf32>
    %cst_65 = arith.constant 1.000000e+00 : f32
    %196 = vector.broadcast %cst_65 : f32 to vector<2x96xf32>
    %197 = arith.addf %196, %195 : vector<2x96xf32>
    %198 = arith.divf %196, %197 : vector<2x96xf32>
    %199 = vector.extract_strided_slice %198 {offsets = [0, 0], sizes = [2, 32], strides = [1, 1]} : vector<2x96xf32> to vector<2x32xf32>
    %200 = vector.extract_strided_slice %198 {offsets = [0, 32], sizes = [2, 32], strides = [1, 1]} : vector<2x96xf32> to vector<2x32xf32>
    %201 = vector.extract_strided_slice %198 {offsets = [0, 64], sizes = [2, 32], strides = [1, 1]} : vector<2x96xf32> to vector<2x32xf32>
    %202 = vector.extract_strided_slice %192 {offsets = [0, 96], sizes = [2, 32], strides = [1, 1]} : vector<2x128xf32> to vector<2x32xf32>
    %203 = math.tanh %202 : vector<2x32xf32>
    %204 = arith.mulf %200, %180 : vector<2x32xf32>
    %205 = arith.mulf %199, %203 : vector<2x32xf32>
    %206 = arith.addf %204, %205 : vector<2x32xf32>
    %207 = math.tanh %206 : vector<2x32xf32>
    %208 = arith.mulf %201, %207 : vector<2x32xf32>
    %209 = arith.index_cast %c7_i32 : i32 to index
    %c0_66 = arith.constant 0 : index
    %c0_67 = arith.constant 0 : index
    %210 = vector.load %arg4[%209, %c0_66, %c0_67] : memref<8x2x32xf32, #tpu.memory_space<vmem>>, vector<1x2x32xf32>
    %211 = vector.shape_cast %210 : vector<1x2x32xf32> to vector<2x32xf32>
    %212 = vector.shape_cast %208 : vector<2x32xf32> to vector<1x2x32xf32>
    tpu.vector_store %arg4[%209, %c0_66, %c0_67], %212 {strides = array<i32>} : memref<8x2x32xf32, #tpu.memory_space<vmem>>, vector<1x2x32xf32>,
    %c8_i32 = arith.constant 8 : i32
    %c0_68 = arith.constant 0 : index
    %c0_69 = arith.constant 0 : index
    %213 = vector.load %arg6[%c0_68, %c0_69] : memref<2x32xf32, #tpu.memory_space<vmem>>, vector<2x32xf32>
    tpu.vector_store %arg6[%c0_68, %c0_69], %208 {strides = array<i32>} : memref<2x32xf32, #tpu.memory_space<vmem>>, vector<2x32xf32>,
    %c0_70 = arith.constant 0 : index
    %c0_71 = arith.constant 0 : index
    %214 = vector.load %arg7[%c0_70, %c0_71] : memref<2x32xf32, #tpu.memory_space<vmem>>, vector<2x32xf32>
    tpu.vector_store %arg7[%c0_70, %c0_71], %206 {strides = array<i32>} : memref<2x32xf32, #tpu.memory_space<vmem>>, vector<2x32xf32>,
    %c0_i32_72 = arith.constant 0 : i32
    %215 = arith.cmpi eq, %arg1, %c0_i32_72 : i32
    %216 = arith.extui %215 : i1 to i32
    %c0_i32_73 = arith.constant 0 : i32
    %217 = arith.cmpi ne, %216, %c0_i32_73 : i32
    scf.if %217 {
      %c0_74 = arith.constant 0 : index
      %c0_75 = arith.constant 0 : index
      %218 = vector.load %arg5[%c0_74, %c0_75] : memref<2x32xf32, #tpu.memory_space<vmem>>, vector<2x32xf32>
      tpu.vector_store %arg5[%c0_74, %c0_75], %206 {strides = array<i32>} : memref<2x32xf32, #tpu.memory_space<vmem>>, vector<2x32xf32>,
    } else {
    }
    return
  }
  func.func @transform_0(%arg0: i32, %arg1: i32) -> (i32, i32, i32) {
    %c0_i32 = arith.constant 0 : i32
    %c0_i32_0 = arith.constant 0 : i32
    return %arg1, %arg0, %c0_i32 : i32, i32, i32
  }
  func.func @transform_1(%arg0: i32, %arg1: i32) -> (i32, i32) {
    %c0_i32 = arith.constant 0 : i32
    %c0_i32_0 = arith.constant 0 : i32
    %c0_i32_1 = arith.constant 0 : i32
    return %c0_i32, %c0_i32_0 : i32, i32
  }
  func.func @transform_2(%arg0: i32, %arg1: i32) -> (i32, i32, i32) {
    %c0_i32 = arith.constant 0 : i32
    %c0_i32_0 = arith.constant 0 : i32
    return %arg1, %arg0, %c0_i32 : i32, i32, i32
  }
  func.func @transform_3(%arg0: i32, %arg1: i32) -> (i32, i32) {
    %c0_i32 = arith.constant 0 : i32
    %c0_i32_0 = arith.constant 0 : i32
    return %arg0, %c0_i32 : i32, i32
  }
}

module attributes {stable_mosaic.version = 11 : i64} {
  func.func @kernel(%arg0: i32, %arg1: i32, %arg2: memref<8x2x128xf32, #tpu.memory_space<vmem>>, %arg3: memref<32x128xf32, #tpu.memory_space<vmem>>, %arg4: memref<8x2x32xf32, #tpu.memory_space<vmem>>, %arg5: memref<2x32xf32, #tpu.memory_space<vmem>>, %arg6: memref<2x32xf32, #tpu.memory_space<vmem>>, %arg7: memref<2x32xf32, #tpu.memory_space<vmem>>) attributes {dimension_semantics = [#tpu.dimension_semantics<parallel>, #tpu.dimension_semantics<arbitrary>], iteration_bounds = array<i64: 1, 1>, scalar_prefetch = 0 : i64, scratch_operands = 2 : i64, tpu.core_type = #tpu.core_type<tc>, window_params = [{transform_indices = @transform_0, window_bounds = array<i64: 8, 2, 128>}, {pipeline_mode = #tpu.pipeline_mode<synchronous>, transform_indices = @transform_1, window_bounds = array<i64: 32, 128>}, {transform_indices = @transform_2, window_bounds = array<i64: 8, 2, 32>}, {transform_indices = @transform_3, window_bounds = array<i64: 2, 32>}]} {
    %c0_i32 = arith.constant 0 : i32
    %0 = arith.cmpi eq, %arg1, %c0_i32 : i32
    %1 = arith.extui %0 : i1 to i32
    %c0_i32_0 = arith.constant 0 : i32
    %2 = arith.cmpi ne, %1, %c0_i32_0 : i32
    scf.if %2 {
      %cst_74 = arith.constant 0.000000e+00 : f32
      %218 = vector.broadcast %cst_74 : f32 to vector<2x32xf32>
      %c0_75 = arith.constant 0 : index
      %c0_76 = arith.constant 0 : index
      %219 = vector.load %arg6[%c0_75, %c0_76] : memref<2x32xf32, #tpu.memory_space<vmem>>, vector<2x32xf32>
      tpu.vector_store %arg6[%c0_75, %c0_76], %218 {strides = array<i32>} : memref<2x32xf32, #tpu.memory_space<vmem>>, vector<2x32xf32>,
      %cst_77 = arith.constant 0.000000e+00 : f32
      %220 = vector.broadcast %cst_77 : f32 to vector<2x32xf32>
      %c0_78 = arith.constant 0 : index
      %c0_79 = arith.constant 0 : index
      %221 = vector.load %arg7[%c0_78, %c0_79] : memref<2x32xf32, #tpu.memory_space<vmem>>, vector<2x32xf32>
      tpu.vector_store %arg7[%c0_78, %c0_79], %220 {strides = array<i32>} : memref<2x32xf32, #tpu.memory_space<vmem>>, vector<2x32xf32>,
    } else {
    }
    %c0 = arith.constant 0 : index
    %c0_1 = arith.constant 0 : index
    %3 = vector.load %arg6[%c0, %c0_1] : memref<2x32xf32, #tpu.memory_space<vmem>>, vector<2x32xf32>
    %c0_2 = arith.constant 0 : index
    %c0_3 = arith.constant 0 : index
    %4 = vector.load %arg7[%c0_2, %c0_3] : memref<2x32xf32, #tpu.memory_space<vmem>>, vector<2x32xf32>
    %c0_i32_4 = arith.constant 0 : i32
    %5 = arith.index_cast %c0_i32_4 : i32 to index
    %c0_5 = arith.constant 0 : index
    %c0_6 = arith.constant 0 : index
    %6 = vector.load %arg2[%5, %c0_5, %c0_6] : memref<8x2x128xf32, #tpu.memory_space<vmem>>, vector<1x2x128xf32>
    %7 = vector.shape_cast %6 : vector<1x2x128xf32> to vector<2x128xf32>
    %c0_7 = arith.constant 0 : index
    %c0_8 = arith.constant 0 : index
    %8 = vector.load %arg3[%c0_7, %c0_8] : memref<32x128xf32, #tpu.memory_space<vmem>>, vector<32x128xf32>
    %cst = arith.constant dense<0.000000e+00> : vector<2x128xf32>
    %9 = tpu.matmul %3, %8, %cst {dimension_numbers = #tpu.dot_dimension_numbers<[1], [0], [0], [1], [0, 0, 1, 1], [], []>} : vector<2x32xf32>, vector<32x128xf32>, vector<2x128xf32> -> vector<2x128xf32>
    %10 = arith.addf %7, %9 : vector<2x128xf32>
    %11 = vector.extract_strided_slice %10 {offsets = [0, 0], sizes = [2, 96], strides = [1, 1]} : vector<2x128xf32> to vector<2x96xf32>
    %12 = arith.negf %11 : vector<2x96xf32>
    %13 = math.exp %12 : vector<2x96xf32>
    %cst_9 = arith.constant 1.000000e+00 : f32
    %14 = vector.broadcast %cst_9 : f32 to vector<2x96xf32>
    %15 = arith.addf %14, %13 : vector<2x96xf32>
    %16 = arith.divf %14, %15 : vector<2x96xf32>
    %17 = vector.extract_strided_slice %16 {offsets = [0, 0], sizes = [2, 32], strides = [1, 1]} : vector<2x96xf32> to vector<2x32xf32>
    %18 = vector.extract_strided_slice %16 {offsets = [0, 32], sizes = [2, 32], strides = [1, 1]} : vector<2x96xf32> to vector<2x32xf32>
    %19 = vector.extract_strided_slice %16 {offsets = [0, 64], sizes = [2, 32], strides = [1, 1]} : vector<2x96xf32> to vector<2x32xf32>
    %20 = vector.extract_strided_slice %10 {offsets = [0, 96], sizes = [2, 32], strides = [1, 1]} : vector<2x128xf32> to vector<2x32xf32>
    %21 = math.tanh %20 : vector<2x32xf32>
    %22 = arith.mulf %18, %4 : vector<2x32xf32>
    %23 = arith.mulf %17, %21 : vector<2x32xf32>
    %24 = arith.addf %22, %23 : vector<2x32xf32>
    %25 = math.tanh %24 : vector<2x32xf32>
    %26 = arith.mulf %19, %25 : vector<2x32xf32>
    %27 = arith.index_cast %c0_i32_4 : i32 to index
    %c0_10 = arith.constant 0 : index
    %c0_11 = arith.constant 0 : index
    %28 = vector.load %arg4[%27, %c0_10, %c0_11] : memref<8x2x32xf32, #tpu.memory_space<vmem>>, vector<1x2x32xf32>
    %29 = vector.shape_cast %28 : vector<1x2x32xf32> to vector<2x32xf32>
    %30 = vector.shape_cast %26 : vector<2x32xf32> to vector<1x2x32xf32>
    tpu.vector_store %arg4[%27, %c0_10, %c0_11], %30 {strides = array<i32>} : memref<8x2x32xf32, #tpu.memory_space<vmem>>, vector<1x2x32xf32>,
    %c1_i32 = arith.constant 1 : i32
    %31 = arith.index_cast %c1_i32 : i32 to index
    %c0_12 = arith.constant 0 : index
    %c0_13 = arith.constant 0 : index
    %32 = vector.load %arg2[%31, %c0_12, %c0_13] : memref<8x2x128xf32, #tpu.memory_space<vmem>>, vector<1x2x128xf32>
    %33 = vector.shape_cast %32 : vector<1x2x128xf32> to vector<2x128xf32>
    %c0_14 = arith.constant 0 : index
    %c0_15 = arith.constant 0 : index
    %34 = vector.load %arg3[%c0_14, %c0_15] : memref<32x128xf32, #tpu.memory_space<vmem>>, vector<32x128xf32>
    %cst_16 = arith.constant dense<0.000000e+00> : vector<2x128xf32>
    %35 = tpu.matmul %26, %34, %cst_16 {dimension_numbers = #tpu.dot_dimension_numbers<[1], [0], [0], [1], [0, 0, 1, 1], [], []>} : vector<2x32xf32>, vector<32x128xf32>, vector<2x128xf32> -> vector<2x128xf32>
    %36 = arith.addf %33, %35 : vector<2x128xf32>
    %37 = vector.extract_strided_slice %36 {offsets = [0, 0], sizes = [2, 96], strides = [1, 1]} : vector<2x128xf32> to vector<2x96xf32>
    %38 = arith.negf %37 : vector<2x96xf32>
    %39 = math.exp %38 : vector<2x96xf32>
    %cst_17 = arith.constant 1.000000e+00 : f32
    %40 = vector.broadcast %cst_17 : f32 to vector<2x96xf32>
    %41 = arith.addf %40, %39 : vector<2x96xf32>
    %42 = arith.divf %40, %41 : vector<2x96xf32>
    %43 = vector.extract_strided_slice %42 {offsets = [0, 0], sizes = [2, 32], strides = [1, 1]} : vector<2x96xf32> to vector<2x32xf32>
    %44 = vector.extract_strided_slice %42 {offsets = [0, 32], sizes = [2, 32], strides = [1, 1]} : vector<2x96xf32> to vector<2x32xf32>
    %45 = vector.extract_strided_slice %42 {offsets = [0, 64], sizes = [2, 32], strides = [1, 1]} : vector<2x96xf32> to vector<2x32xf32>
    %46 = vector.extract_strided_slice %36 {offsets = [0, 96], sizes = [2, 32], strides = [1, 1]} : vector<2x128xf32> to vector<2x32xf32>
    %47 = math.tanh %46 : vector<2x32xf32>
    %48 = arith.mulf %44, %24 : vector<2x32xf32>
    %49 = arith.mulf %43, %47 : vector<2x32xf32>
    %50 = arith.addf %48, %49 : vector<2x32xf32>
    %51 = math.tanh %50 : vector<2x32xf32>
    %52 = arith.mulf %45, %51 : vector<2x32xf32>
    %53 = arith.index_cast %c1_i32 : i32 to index
    %c0_18 = arith.constant 0 : index
    %c0_19 = arith.constant 0 : index
    %54 = vector.load %arg4[%53, %c0_18, %c0_19] : memref<8x2x32xf32, #tpu.memory_space<vmem>>, vector<1x2x32xf32>
    %55 = vector.shape_cast %54 : vector<1x2x32xf32> to vector<2x32xf32>
    %56 = vector.shape_cast %52 : vector<2x32xf32> to vector<1x2x32xf32>
    tpu.vector_store %arg4[%53, %c0_18, %c0_19], %56 {strides = array<i32>} : memref<8x2x32xf32, #tpu.memory_space<vmem>>, vector<1x2x32xf32>,
    %c2_i32 = arith.constant 2 : i32
    %57 = arith.index_cast %c2_i32 : i32 to index
    %c0_20 = arith.constant 0 : index
    %c0_21 = arith.constant 0 : index
    %58 = vector.load %arg2[%57, %c0_20, %c0_21] : memref<8x2x128xf32, #tpu.memory_space<vmem>>, vector<1x2x128xf32>
    %59 = vector.shape_cast %58 : vector<1x2x128xf32> to vector<2x128xf32>
    %c0_22 = arith.constant 0 : index
    %c0_23 = arith.constant 0 : index
    %60 = vector.load %arg3[%c0_22, %c0_23] : memref<32x128xf32, #tpu.memory_space<vmem>>, vector<32x128xf32>
    %cst_24 = arith.constant dense<0.000000e+00> : vector<2x128xf32>
    %61 = tpu.matmul %52, %60, %cst_24 {dimension_numbers = #tpu.dot_dimension_numbers<[1], [0], [0], [1], [0, 0, 1, 1], [], []>} : vector<2x32xf32>, vector<32x128xf32>, vector<2x128xf32> -> vector<2x128xf32>
    %62 = arith.addf %59, %61 : vector<2x128xf32>
    %63 = vector.extract_strided_slice %62 {offsets = [0, 0], sizes = [2, 96], strides = [1, 1]} : vector<2x128xf32> to vector<2x96xf32>
    %64 = arith.negf %63 : vector<2x96xf32>
    %65 = math.exp %64 : vector<2x96xf32>
    %cst_25 = arith.constant 1.000000e+00 : f32
    %66 = vector.broadcast %cst_25 : f32 to vector<2x96xf32>
    %67 = arith.addf %66, %65 : vector<2x96xf32>
    %68 = arith.divf %66, %67 : vector<2x96xf32>
    %69 = vector.extract_strided_slice %68 {offsets = [0, 0], sizes = [2, 32], strides = [1, 1]} : vector<2x96xf32> to vector<2x32xf32>
    %70 = vector.extract_strided_slice %68 {offsets = [0, 32], sizes = [2, 32], strides = [1, 1]} : vector<2x96xf32> to vector<2x32xf32>
    %71 = vector.extract_strided_slice %68 {offsets = [0, 64], sizes = [2, 32], strides = [1, 1]} : vector<2x96xf32> to vector<2x32xf32>
    %72 = vector.extract_strided_slice %62 {offsets = [0, 96], sizes = [2, 32], strides = [1, 1]} : vector<2x128xf32> to vector<2x32xf32>
    %73 = math.tanh %72 : vector<2x32xf32>
    %74 = arith.mulf %70, %50 : vector<2x32xf32>
    %75 = arith.mulf %69, %73 : vector<2x32xf32>
    %76 = arith.addf %74, %75 : vector<2x32xf32>
    %77 = math.tanh %76 : vector<2x32xf32>
    %78 = arith.mulf %71, %77 : vector<2x32xf32>
    %79 = arith.index_cast %c2_i32 : i32 to index
    %c0_26 = arith.constant 0 : index
    %c0_27 = arith.constant 0 : index
    %80 = vector.load %arg4[%79, %c0_26, %c0_27] : memref<8x2x32xf32, #tpu.memory_space<vmem>>, vector<1x2x32xf32>
    %81 = vector.shape_cast %80 : vector<1x2x32xf32> to vector<2x32xf32>
    %82 = vector.shape_cast %78 : vector<2x32xf32> to vector<1x2x32xf32>
    tpu.vector_store %arg4[%79, %c0_26, %c0_27], %82 {strides = array<i32>} : memref<8x2x32xf32, #tpu.memory_space<vmem>>, vector<1x2x32xf32>,
    %c3_i32 = arith.constant 3 : i32
    %83 = arith.index_cast %c3_i32 : i32 to index
    %c0_28 = arith.constant 0 : index
    %c0_29 = arith.constant 0 : index
    %84 = vector.load %arg2[%83, %c0_28, %c0_29] : memref<8x2x128xf32, #tpu.memory_space<vmem>>, vector<1x2x128xf32>
    %85 = vector.shape_cast %84 : vector<1x2x128xf32> to vector<2x128xf32>
    %c0_30 = arith.constant 0 : index
    %c0_31 = arith.constant 0 : index
    %86 = vector.load %arg3[%c0_30, %c0_31] : memref<32x128xf32, #tpu.memory_space<vmem>>, vector<32x128xf32>
    %cst_32 = arith.constant dense<0.000000e+00> : vector<2x128xf32>
    %87 = tpu.matmul %78, %86, %cst_32 {dimension_numbers = #tpu.dot_dimension_numbers<[1], [0], [0], [1], [0, 0, 1, 1], [], []>} : vector<2x32xf32>, vector<32x128xf32>, vector<2x128xf32> -> vector<2x128xf32>
    %88 = arith.addf %85, %87 : vector<2x128xf32>
    %89 = vector.extract_strided_slice %88 {offsets = [0, 0], sizes = [2, 96], strides = [1, 1]} : vector<2x128xf32> to vector<2x96xf32>
    %90 = arith.negf %89 : vector<2x96xf32>
    %91 = math.exp %90 : vector<2x96xf32>
    %cst_33 = arith.constant 1.000000e+00 : f32
    %92 = vector.broadcast %cst_33 : f32 to vector<2x96xf32>
    %93 = arith.addf %92, %91 : vector<2x96xf32>
    %94 = arith.divf %92, %93 : vector<2x96xf32>
    %95 = vector.extract_strided_slice %94 {offsets = [0, 0], sizes = [2, 32], strides = [1, 1]} : vector<2x96xf32> to vector<2x32xf32>
    %96 = vector.extract_strided_slice %94 {offsets = [0, 32], sizes = [2, 32], strides = [1, 1]} : vector<2x96xf32> to vector<2x32xf32>
    %97 = vector.extract_strided_slice %94 {offsets = [0, 64], sizes = [2, 32], strides = [1, 1]} : vector<2x96xf32> to vector<2x32xf32>
    %98 = vector.extract_strided_slice %88 {offsets = [0, 96], sizes = [2, 32], strides = [1, 1]} : vector<2x128xf32> to vector<2x32xf32>
    %99 = math.tanh %98 : vector<2x32xf32>
    %100 = arith.mulf %96, %76 : vector<2x32xf32>
    %101 = arith.mulf %95, %99 : vector<2x32xf32>
    %102 = arith.addf %100, %101 : vector<2x32xf32>
    %103 = math.tanh %102 : vector<2x32xf32>
    %104 = arith.mulf %97, %103 : vector<2x32xf32>
    %105 = arith.index_cast %c3_i32 : i32 to index
    %c0_34 = arith.constant 0 : index
    %c0_35 = arith.constant 0 : index
    %106 = vector.load %arg4[%105, %c0_34, %c0_35] : memref<8x2x32xf32, #tpu.memory_space<vmem>>, vector<1x2x32xf32>
    %107 = vector.shape_cast %106 : vector<1x2x32xf32> to vector<2x32xf32>
    %108 = vector.shape_cast %104 : vector<2x32xf32> to vector<1x2x32xf32>
    tpu.vector_store %arg4[%105, %c0_34, %c0_35], %108 {strides = array<i32>} : memref<8x2x32xf32, #tpu.memory_space<vmem>>, vector<1x2x32xf32>,
    %c4_i32 = arith.constant 4 : i32
    %109 = arith.index_cast %c4_i32 : i32 to index
    %c0_36 = arith.constant 0 : index
    %c0_37 = arith.constant 0 : index
    %110 = vector.load %arg2[%109, %c0_36, %c0_37] : memref<8x2x128xf32, #tpu.memory_space<vmem>>, vector<1x2x128xf32>
    %111 = vector.shape_cast %110 : vector<1x2x128xf32> to vector<2x128xf32>
    %c0_38 = arith.constant 0 : index
    %c0_39 = arith.constant 0 : index
    %112 = vector.load %arg3[%c0_38, %c0_39] : memref<32x128xf32, #tpu.memory_space<vmem>>, vector<32x128xf32>
    %cst_40 = arith.constant dense<0.000000e+00> : vector<2x128xf32>
    %113 = tpu.matmul %104, %112, %cst_40 {dimension_numbers = #tpu.dot_dimension_numbers<[1], [0], [0], [1], [0, 0, 1, 1], [], []>} : vector<2x32xf32>, vector<32x128xf32>, vector<2x128xf32> -> vector<2x128xf32>
    %114 = arith.addf %111, %113 : vector<2x128xf32>
    %115 = vector.extract_strided_slice %114 {offsets = [0, 0], sizes = [2, 96], strides = [1, 1]} : vector<2x128xf32> to vector<2x96xf32>
    %116 = arith.negf %115 : vector<2x96xf32>
    %117 = math.exp %116 : vector<2x96xf32>
    %cst_41 = arith.constant 1.000000e+00 : f32
    %118 = vector.broadcast %cst_41 : f32 to vector<2x96xf32>
    %119 = arith.addf %118, %117 : vector<2x96xf32>
    %120 = arith.divf %118, %119 : vector<2x96xf32>
    %121 = vector.extract_strided_slice %120 {offsets = [0, 0], sizes = [2, 32], strides = [1, 1]} : vector<2x96xf32> to vector<2x32xf32>
    %122 = vector.extract_strided_slice %120 {offsets = [0, 32], sizes = [2, 32], strides = [1, 1]} : vector<2x96xf32> to vector<2x32xf32>
    %123 = vector.extract_strided_slice %120 {offsets = [0, 64], sizes = [2, 32], strides = [1, 1]} : vector<2x96xf32> to vector<2x32xf32>
    %124 = vector.extract_strided_slice %114 {offsets = [0, 96], sizes = [2, 32], strides = [1, 1]} : vector<2x128xf32> to vector<2x32xf32>
    %125 = math.tanh %124 : vector<2x32xf32>
    %126 = arith.mulf %122, %102 : vector<2x32xf32>
    %127 = arith.mulf %121, %125 : vector<2x32xf32>
    %128 = arith.addf %126, %127 : vector<2x32xf32>
    %129 = math.tanh %128 : vector<2x32xf32>
    %130 = arith.mulf %123, %129 : vector<2x32xf32>
    %131 = arith.index_cast %c4_i32 : i32 to index
    %c0_42 = arith.constant 0 : index
    %c0_43 = arith.constant 0 : index
    %132 = vector.load %arg4[%131, %c0_42, %c0_43] : memref<8x2x32xf32, #tpu.memory_space<vmem>>, vector<1x2x32xf32>
    %133 = vector.shape_cast %132 : vector<1x2x32xf32> to vector<2x32xf32>
    %134 = vector.shape_cast %130 : vector<2x32xf32> to vector<1x2x32xf32>
    tpu.vector_store %arg4[%131, %c0_42, %c0_43], %134 {strides = array<i32>} : memref<8x2x32xf32, #tpu.memory_space<vmem>>, vector<1x2x32xf32>,
    %c5_i32 = arith.constant 5 : i32
    %135 = arith.index_cast %c5_i32 : i32 to index
    %c0_44 = arith.constant 0 : index
    %c0_45 = arith.constant 0 : index
    %136 = vector.load %arg2[%135, %c0_44, %c0_45] : memref<8x2x128xf32, #tpu.memory_space<vmem>>, vector<1x2x128xf32>
    %137 = vector.shape_cast %136 : vector<1x2x128xf32> to vector<2x128xf32>
    %c0_46 = arith.constant 0 : index
    %c0_47 = arith.constant 0 : index
    %138 = vector.load %arg3[%c0_46, %c0_47] : memref<32x128xf32, #tpu.memory_space<vmem>>, vector<32x128xf32>
    %cst_48 = arith.constant dense<0.000000e+00> : vector<2x128xf32>
    %139 = tpu.matmul %130, %138, %cst_48 {dimension_numbers = #tpu.dot_dimension_numbers<[1], [0], [0], [1], [0, 0, 1, 1], [], []>} : vector<2x32xf32>, vector<32x128xf32>, vector<2x128xf32> -> vector<2x128xf32>
    %140 = arith.addf %137, %139 : vector<2x128xf32>
    %141 = vector.extract_strided_slice %140 {offsets = [0, 0], sizes = [2, 96], strides = [1, 1]} : vector<2x128xf32> to vector<2x96xf32>
    %142 = arith.negf %141 : vector<2x96xf32>
    %143 = math.exp %142 : vector<2x96xf32>
    %cst_49 = arith.constant 1.000000e+00 : f32
    %144 = vector.broadcast %cst_49 : f32 to vector<2x96xf32>
    %145 = arith.addf %144, %143 : vector<2x96xf32>
    %146 = arith.divf %144, %145 : vector<2x96xf32>
    %147 = vector.extract_strided_slice %146 {offsets = [0, 0], sizes = [2, 32], strides = [1, 1]} : vector<2x96xf32> to vector<2x32xf32>
    %148 = vector.extract_strided_slice %146 {offsets = [0, 32], sizes = [2, 32], strides = [1, 1]} : vector<2x96xf32> to vector<2x32xf32>
    %149 = vector.extract_strided_slice %146 {offsets = [0, 64], sizes = [2, 32], strides = [1, 1]} : vector<2x96xf32> to vector<2x32xf32>
    %150 = vector.extract_strided_slice %140 {offsets = [0, 96], sizes = [2, 32], strides = [1, 1]} : vector<2x128xf32> to vector<2x32xf32>
    %151 = math.tanh %150 : vector<2x32xf32>
    %152 = arith.mulf %148, %128 : vector<2x32xf32>
    %153 = arith.mulf %147, %151 : vector<2x32xf32>
    %154 = arith.addf %152, %153 : vector<2x32xf32>
    %155 = math.tanh %154 : vector<2x32xf32>
    %156 = arith.mulf %149, %155 : vector<2x32xf32>
    %157 = arith.index_cast %c5_i32 : i32 to index
    %c0_50 = arith.constant 0 : index
    %c0_51 = arith.constant 0 : index
    %158 = vector.load %arg4[%157, %c0_50, %c0_51] : memref<8x2x32xf32, #tpu.memory_space<vmem>>, vector<1x2x32xf32>
    %159 = vector.shape_cast %158 : vector<1x2x32xf32> to vector<2x32xf32>
    %160 = vector.shape_cast %156 : vector<2x32xf32> to vector<1x2x32xf32>
    tpu.vector_store %arg4[%157, %c0_50, %c0_51], %160 {strides = array<i32>} : memref<8x2x32xf32, #tpu.memory_space<vmem>>, vector<1x2x32xf32>,
    %c6_i32 = arith.constant 6 : i32
    %161 = arith.index_cast %c6_i32 : i32 to index
    %c0_52 = arith.constant 0 : index
    %c0_53 = arith.constant 0 : index
    %162 = vector.load %arg2[%161, %c0_52, %c0_53] : memref<8x2x128xf32, #tpu.memory_space<vmem>>, vector<1x2x128xf32>
    %163 = vector.shape_cast %162 : vector<1x2x128xf32> to vector<2x128xf32>
    %c0_54 = arith.constant 0 : index
    %c0_55 = arith.constant 0 : index
    %164 = vector.load %arg3[%c0_54, %c0_55] : memref<32x128xf32, #tpu.memory_space<vmem>>, vector<32x128xf32>
    %cst_56 = arith.constant dense<0.000000e+00> : vector<2x128xf32>
    %165 = tpu.matmul %156, %164, %cst_56 {dimension_numbers = #tpu.dot_dimension_numbers<[1], [0], [0], [1], [0, 0, 1, 1], [], []>} : vector<2x32xf32>, vector<32x128xf32>, vector<2x128xf32> -> vector<2x128xf32>
    %166 = arith.addf %163, %165 : vector<2x128xf32>
    %167 = vector.extract_strided_slice %166 {offsets = [0, 0], sizes = [2, 96], strides = [1, 1]} : vector<2x128xf32> to vector<2x96xf32>
    %168 = arith.negf %167 : vector<2x96xf32>
    %169 = math.exp %168 : vector<2x96xf32>
    %cst_57 = arith.constant 1.000000e+00 : f32
    %170 = vector.broadcast %cst_57 : f32 to vector<2x96xf32>
    %171 = arith.addf %170, %169 : vector<2x96xf32>
    %172 = arith.divf %170, %171 : vector<2x96xf32>
    %173 = vector.extract_strided_slice %172 {offsets = [0, 0], sizes = [2, 32], strides = [1, 1]} : vector<2x96xf32> to vector<2x32xf32>
    %174 = vector.extract_strided_slice %172 {offsets = [0, 32], sizes = [2, 32], strides = [1, 1]} : vector<2x96xf32> to vector<2x32xf32>
    %175 = vector.extract_strided_slice %172 {offsets = [0, 64], sizes = [2, 32], strides = [1, 1]} : vector<2x96xf32> to vector<2x32xf32>
    %176 = vector.extract_strided_slice %166 {offsets = [0, 96], sizes = [2, 32], strides = [1, 1]} : vector<2x128xf32> to vector<2x32xf32>
    %177 = math.tanh %176 : vector<2x32xf32>
    %178 = arith.mulf %174, %154 : vector<2x32xf32>
    %179 = arith.mulf %173, %177 : vector<2x32xf32>
    %180 = arith.addf %178, %179 : vector<2x32xf32>
    %181 = math.tanh %180 : vector<2x32xf32>
    %182 = arith.mulf %175, %181 : vector<2x32xf32>
    %183 = arith.index_cast %c6_i32 : i32 to index
    %c0_58 = arith.constant 0 : index
    %c0_59 = arith.constant 0 : index
    %184 = vector.load %arg4[%183, %c0_58, %c0_59] : memref<8x2x32xf32, #tpu.memory_space<vmem>>, vector<1x2x32xf32>
    %185 = vector.shape_cast %184 : vector<1x2x32xf32> to vector<2x32xf32>
    %186 = vector.shape_cast %182 : vector<2x32xf32> to vector<1x2x32xf32>
    tpu.vector_store %arg4[%183, %c0_58, %c0_59], %186 {strides = array<i32>} : memref<8x2x32xf32, #tpu.memory_space<vmem>>, vector<1x2x32xf32>,
    %c7_i32 = arith.constant 7 : i32
    %187 = arith.index_cast %c7_i32 : i32 to index
    %c0_60 = arith.constant 0 : index
    %c0_61 = arith.constant 0 : index
    %188 = vector.load %arg2[%187, %c0_60, %c0_61] : memref<8x2x128xf32, #tpu.memory_space<vmem>>, vector<1x2x128xf32>
    %189 = vector.shape_cast %188 : vector<1x2x128xf32> to vector<2x128xf32>
    %c0_62 = arith.constant 0 : index
    %c0_63 = arith.constant 0 : index
    %190 = vector.load %arg3[%c0_62, %c0_63] : memref<32x128xf32, #tpu.memory_space<vmem>>, vector<32x128xf32>
    %cst_64 = arith.constant dense<0.000000e+00> : vector<2x128xf32>
    %191 = tpu.matmul %182, %190, %cst_64 {dimension_numbers = #tpu.dot_dimension_numbers<[1], [0], [0], [1], [0, 0, 1, 1], [], []>} : vector<2x32xf32>, vector<32x128xf32>, vector<2x128xf32> -> vector<2x128xf32>
    %192 = arith.addf %189, %191 : vector<2x128xf32>
    %193 = vector.extract_strided_slice %192 {offsets = [0, 0], sizes = [2, 96], strides = [1, 1]} : vector<2x128xf32> to vector<2x96xf32>
    %194 = arith.negf %193 : vector<2x96xf32>
    %195 = math.exp %194 : vector<2x96xf32>
    %cst_65 = arith.constant 1.000000e+00 : f32
    %196 = vector.broadcast %cst_65 : f32 to vector<2x96xf32>
    %197 = arith.addf %196, %195 : vector<2x96xf32>
    %198 = arith.divf %196, %197 : vector<2x96xf32>
    %199 = vector.extract_strided_slice %198 {offsets = [0, 0], sizes = [2, 32], strides = [1, 1]} : vector<2x96xf32> to vector<2x32xf32>
    %200 = vector.extract_strided_slice %198 {offsets = [0, 32], sizes = [2, 32], strides = [1, 1]} : vector<2x96xf32> to vector<2x32xf32>
    %201 = vector.extract_strided_slice %198 {offsets = [0, 64], sizes = [2, 32], strides = [1, 1]} : vector<2x96xf32> to vector<2x32xf32>
    %202 = vector.extract_strided_slice %192 {offsets = [0, 96], sizes = [2, 32], strides = [1, 1]} : vector<2x128xf32> to vector<2x32xf32>
    %203 = math.tanh %202 : vector<2x32xf32>
    %204 = arith.mulf %200, %180 : vector<2x32xf32>
    %205 = arith.mulf %199, %203 : vector<2x32xf32>
    %206 = arith.addf %204, %205 : vector<2x32xf32>
    %207 = math.tanh %206 : vector<2x32xf32>
    %208 = arith.mulf %201, %207 : vector<2x32xf32>
    %209 = arith.index_cast %c7_i32 : i32 to index
    %c0_66 = arith.constant 0 : index
    %c0_67 = arith.constant 0 : index
    %210 = vector.load %arg4[%209, %c0_66, %c0_67] : memref<8x2x32xf32, #tpu.memory_space<vmem>>, vector<1x2x32xf32>
    %211 = vector.shape_cast %210 : vector<1x2x32xf32> to vector<2x32xf32>
    %212 = vector.shape_cast %208 : vector<2x32xf32> to vector<1x2x32xf32>
    tpu.vector_store %arg4[%209, %c0_66, %c0_67], %212 {strides = array<i32>} : memref<8x2x32xf32, #tpu.memory_space<vmem>>, vector<1x2x32xf32>,
    %c8_i32 = arith.constant 8 : i32
    %c0_68 = arith.constant 0 : index
    %c0_69 = arith.constant 0 : index
    %213 = vector.load %arg6[%c0_68, %c0_69] : memref<2x32xf32, #tpu.memory_space<vmem>>, vector<2x32xf32>
    tpu.vector_store %arg6[%c0_68, %c0_69], %208 {strides = array<i32>} : memref<2x32xf32, #tpu.memory_space<vmem>>, vector<2x32xf32>,
    %c0_70 = arith.constant 0 : index
    %c0_71 = arith.constant 0 : index
    %214 = vector.load %arg7[%c0_70, %c0_71] : memref<2x32xf32, #tpu.memory_space<vmem>>, vector<2x32xf32>
    tpu.vector_store %arg7[%c0_70, %c0_71], %206 {strides = array<i32>} : memref<2x32xf32, #tpu.memory_space<vmem>>, vector<2x32xf32>,
    %c0_i32_72 = arith.constant 0 : i32
    %215 = arith.cmpi eq, %arg1, %c0_i32_72 : i32
    %216 = arith.extui %215 : i1 to i32
    %c0_i32_73 = arith.constant 0 : i32
    %217 = arith.cmpi ne, %216, %c0_i32_73 : i32
    scf.if %217 {
      %c0_74 = arith.constant 0 : index
      %c0_75 = arith.constant 0 : index
      %218 = vector.load %arg5[%c0_74, %c0_75] : memref<2x32xf32, #tpu.memory_space<vmem>>, vector<2x32xf32>
      tpu.vector_store %arg5[%c0_74, %c0_75], %206 {strides = array<i32>} : memref<2x32xf32, #tpu.memory_space<vmem>>, vector<2x32xf32>,
    } else {
    }
    return
  }
  func.func @transform_0(%arg0: i32, %arg1: i32) -> (i32, i32, i32) {
    %c0_i32 = arith.constant 0 : i32
    %c0_i32_0 = arith.constant 0 : i32
    return %arg1, %arg0, %c0_i32 : i32, i32, i32
  }
  func.func @transform_1(%arg0: i32, %arg1: i32) -> (i32, i32) {
    %c0_i32 = arith.constant 0 : i32
    %c0_i32_0 = arith.constant 0 : i32
    %c0_i32_1 = arith.constant 0 : i32
    return %c0_i32, %c0_i32_0 : i32, i32
  }
  func.func @transform_2(%arg0: i32, %arg1: i32) -> (i32, i32, i32) {
    %c0_i32 = arith.constant 0 : i32
    %c0_i32_0 = arith.constant 0 : i32
    return %arg1, %arg0, %c0_i32 : i32, i32, i32
  }
  func.func @transform_3(%arg0: i32, %arg1: i32) -> (i32, i32) {
    %c0_i32 = arith.constant 0 : i32
    %c0_i32_0 = arith.constant 0 : i32
    return %arg0, %c0_i32 : i32, i32
  }
}

</mosaic_0001>

<bundles_post_ra>
// kernel: tpu_custom_call.1
= control target key start
LH: loop header
LB: loop body
LE: loop exit
PB: predicated region body
PF: predicated region fallthrough
CT: control target
= control target key end

     0   :  { %9 = vsyncpa [#allocation5], 0  ;;  %s1473_s0 = inlined_call_operand.hbm [shape: f32[8,2,128], index: 0, kind: input, shape index: {}]   ;;  %s1474_s1 = inlined_call_operand.hbm [shape: f32[32,128], index: 1, kind: input, shape index: {}]   ;;  %s1475_s2 = inlined_call_operand.hbm [shape: f32[8,2,32], index: 2, kind: output, shape index: {0}]   ;;  %s1476_s3 = inlined_call_operand.hbm [shape: f32[2,32], index: 3, kind: output, shape index: {1}]  }
   0x1   :  { %10 = vsyncpa [#allocation8], 0 }
   0x2   :  { %11 = vsyncpa [#allocation6], 0 }
   0x3   :  { %12 = vsyncpa [#allocation11], 0  ;;  %s1279_s12 = smov [#allocation4]  }
   0x4   :  { %s18_s13 = sshll.u32 %s1279_s12, 4  ;;  %s19_s13 = int_to_ptr.vmem [resolvable:$true] %s18_s13 }
   0x5   :  { %s1199_s14 = scalar_lea.vmem %s19_s13, 256  ;;  %p1204_p1 = scmp.lt.s32.totalorder %s19_s13, %s19_s13 }
   0x6   :  { %p1200_p0 = scmp.ne.s32.totalorder %s19_s13, %s1199_s14  ;;  %p1205_p2 = scmp.lt.s32.totalorder %s1199_s14, %s1199_s14 }
   0x8   :  { %p1206_p3 = por %p1205_p2, %p1204_p1 }
   0xa   :  { %p1207_p4 = pnand %p1206_p3, %p1200_p0 }
   0xc   :  { %1210 = shalt.err (!%p1207_p4)
}
   0xd   :  { %s1280_s15 = smov 32   ;;  %s1281_s16 = smov 2  }
   0xe   :  { %24 = dma.hbm_to_vmem [thread:$0]  %s1473_s0, 256, %s19_s13, [#allocation5], %s1280_s15, %s1280_s15, %s1281_s16  }
   0xf   :  { %s1282_s19 = smov [#allocation7]  }
  0x10   :  { %s30_s20 = sshll.u32 %s1282_s19, 4  ;;  %s31_s20 = int_to_ptr.vmem [resolvable:$true] %s30_s20 }
  0x11   :  { %s1219_s21 = scalar_lea.vmem %s31_s20, 512  ;;  %p1224_p6 = scmp.lt.s32.totalorder %s31_s20, %s31_s20 }
  0x12   :  { %p1220_p5 = scmp.ne.s32.totalorder %s31_s20, %s1219_s21  ;;  %p1225_p7 = scmp.lt.s32.totalorder %s1219_s21, %s1219_s21 }
  0x14   :  { %p1226_p8 = por %p1225_p7, %p1224_p6 }
  0x16   :  { %p1227_p9 = pnand %p1226_p8, %p1220_p5 }
  0x18   :  { %1230 = shalt.err (!%p1227_p9)
}
  0x19   :  { %s1283_s22 = smov 128   ;;  %s1284_s23 = smov 8  }
  0x1a   :  { %36 = dma.hbm_to_vmem [thread:$0]  %s1474_s1, 512, %s31_s20, [#allocation8], %s1283_s22, %s1283_s22, %s1284_s23  }
  0x1b   :  { %1271 = dma.done.wait [#allocation5], 256  }
  0x1c   :  { %1272 = vsyncadd [#allocation5], 4294967040 }
  0x1d   :  { %1273 = dma.done.wait [#allocation8], 512  }
  0x1e   :  { %1274 = vsyncadd [#allocation8], 4294966784  ;;  %vm47_vm0 = vcmask 254976   ;;  %v1285_v0 = vmov 0.0   ;;  %vm1286_vm1 = vmmov 0   ;;  %v1330_v1 = vld [vmem:[#allocation7 + $0x18] sm:$0xff] }
  0x1f   :  { %1027 = vmatprep.subr.mxu0 %v1285_v0  ;;  %1035 = vmatprep.mubr.msk.f32.mxu0 %vm1286_vm1, %v1285_v0  ;;  %48 = vst.msk [vmem:[#allocation2] sm:$0x3] %vm47_vm0, %v1285_v0  ;;  %49 = vst.msk [vmem:[#allocation3] sm:$0x3] %vm47_vm0, %v1285_v0  ;;  %v1332_v2 = vld [vmem:[#allocation7 + $0x10] sm:$0xff]  ;;  %v1337_v3 = vld [vmem:[#allocation7 + $0x8] sm:$0xff] }
  0x20   :  { %1038 = vmatprep.subr.mxu1 %v1285_v0  ;;  %1046 = vmatprep.mubr.msk.f32.mxu1 %vm1286_vm1, %v1285_v0  ;;  %v1343_v4 = vld [vmem:[#allocation7] sm:$0xff]  ;;  %vm57_vm2 = vcmask 261120   ;;  %v52_v6 = vld [vmem:[#allocation4] sm:$0x3]  ;;  %s1287_s0 = smov 64   ;;  %s1288_s1 = smov 96  }
  0x21   :  { %1028 = vmatpush3.msra.mxu0 %v1330_v1  ;;  %1039 = vmatpush3.msra.mxu1 %v1330_v1  ;;  %v167_v26 = vld [vmem:[#allocation4 + $0x2] sm:$0x3]  ;;  %v276_v44 = vld [vmem:[#allocation4 + $0x4] sm:$0x3]  ;;  %v385_v62 = vld [vmem:[#allocation4 + $0x6] sm:$0x3] }
  0x22   :  { %1029 = vmatprep.subr.mxu0 %v1285_v0  ;;  %1040 = vmatprep.subr.mxu1 %v1285_v0  ;;  %s1289_s26 = smov [#allocation10]  }
  0x23   :  { %1030 = vmatpush3.msra.mxu0 %v1332_v2  ;;  %1041 = vmatpush3.msra.mxu1 %v1332_v2  ;;  %s957_s27 = sshll.u32 %s1289_s26, 4  ;;  %s958_s27 = int_to_ptr.vmem [resolvable:$true] %s957_s27 }
  0x24   :  { %1031 = vmatprep.subr.mxu0 %v1285_v0  ;;  %1042 = vmatprep.subr.mxu1 %v1285_v0  ;;  %s1231_s28 = scalar_lea.vmem %s958_s27, 32  ;;  %p1236_p11 = scmp.lt.s32.totalorder %s958_s27, %s958_s27 }
  0x25   :  { %1032 = vmatpush3.msra.mxu0 %v1337_v3  ;;  %1043 = vmatpush3.msra.mxu1 %v1337_v3  ;;  %p1232_p10 = scmp.ne.s32.totalorder %s958_s27, %s1231_s28  ;;  %p1237_p12 = scmp.lt.s32.totalorder %s1231_s28, %s1231_s28 }
  0x26   :  { %v50_v5 = vld [vmem:[#allocation2] sm:$0x3]  ;;  %1033 = vmatprep.subr.mxu0 %v1285_v0  ;;  %1044 = vmatprep.subr.mxu1 %v1285_v0  ;;  %v51_v11 = vld [vmem:[#allocation3] sm:$0x3] }
  0x27   :  { %1034 = vmatpush3.msra.mxu0 %v1343_v4  ;;  %1045 = vmatpush3.msra.mxu1 %v1343_v4  ;;  %p1238_p13 = por %p1237_p12, %p1236_p11 }
  0x28   :  { %1036 = vmatmul.mubr.msk.f32.vlgmr.msra.gmra.mxu0 %vm57_vm2, %v50_v5  ;;  %1049 = vmatprep.subr.mxu0 %v1285_v0 }
  0x29   :  { %1050 = vmatpush3.msra.mxu0 %v1330_v1  ;;  %1057 = vmatprep.mubr.msk.f32.mxu0 %vm1286_vm1, %v1285_v0  ;;  %p1239_p0 = pnand %p1238_p13, %p1232_p10 }
  0x2a   :  { %1051 = vmatprep.subr.mxu0 %v1285_v0  ;;  %1060 = vmatprep.subr.mxu1 %v1285_v0 }
  0x2b   :  { %1052 = vmatpush3.msra.mxu0 %v1332_v2 }
  0x2c   :  { %1053 = vmatprep.subr.mxu0 %v1285_v0 }
  0x2d   :  { %1054 = vmatpush3.msra.mxu0 %v1337_v3 }
  0x2e   :  { %1055 = vmatprep.subr.mxu0 %v1285_v0 }
  0x2f   :  { %1056 = vmatpush3.msra.mxu0 %v1343_v4 }
  0x30   :  { %1071 = vmatprep.subr.mxu0 %v1285_v0 }
  0xe8   :  { %v127_v7 = vpop.f32.mrf.mxu0 }
  0xe9   :  { %v131_v8 = vadd.f32 %v127_v7, %v52_v6 }
  0xea   :  { %v1037_v9 = vpop.f32.mrf.mxu0 }
  0xeb   :  { %1127 = vtanh.f32 %v131_v8  ;;  %v972_v12 = vmul.f32 -1.442695, %v131_v8 }
  0xed   :  { %1129 = vpow2.f32 %v972_v12 }
  0xf8   :  { %v1128_v10 = vpop.eup %1127 }
  0xf9   :  { %145 = vrot.lane.b32.xlu0 %v1128_v10, %s1280_s15 }
  0xfa   :  { %v1130_v13 = vpop.eup %1129 }
  0xfb   :  { %v135_v14 = vadd.f32 1.0, %v1130_v13 }
  0xfd   :  { %140 = vrot.lane.b32.xlu0 %v51_v11, %s1280_s15  ;;  %1131 = vrcp.f32 %v135_v14 }
 0x10a   :  { %v1132_v15 = vpop.eup %1131 }
 0x16b   :  { %v146_v16 = vpop.permute.xlu0 %145 }
 0x16c   :  { %v148_v17 = vmul.f32 %v1132_v15, %v146_v16 }
 0x16e   :  { %150 = vrot.lane.b32.xlu1 %v148_v17, %s1280_s15 }
 0x16f   :  { %v141_v18 = vpop.permute.xlu0 %140 }
 0x170   :  { %v143_v19 = vmul.f32 %v1132_v15, %v141_v18 }
 0x1e0   :  { %v151_v20 = vpop.permute.xlu1 %150 }
 0x1e1   :  { %v153_v21 = vadd.f32 %v151_v20, %v143_v19 }
 0x1e3   :  { %1133 = vtanh.f32 %v153_v21 }
 0x1f0   :  { %v1134_v22 = vpop.eup %1133 }
 0x1f1   :  { %156 = vrot.lane.b32.xlu1 %v1134_v22, %s1280_s15 }
 0x263   :  { %v157_v23 = vpop.permute.xlu1 %156 }
 0x264   :  { %v159_v24 = vmul.f32 %v1132_v15, %v157_v23 }
 0x266   :  { %161 = vrot.lane.b32.xlu0 %v159_v24, %s1287_s0 }
 0x2d8   :  { %v162_v25 = vpop.permute.xlu0 %161 }
 0x2d9   :  { %165 = vst.msk [vmem:[#allocation9] sm:$0x3] %vm47_vm0, %v162_v25  ;;  %1047 = vmatmul.mubr.msk.f32.vlgmr.msra.gmra.mxu1 %vm57_vm2, %v162_v25 }
 0x2da   :  { %1061 = vmatpush3.msra.mxu1 %v1330_v1  ;;  %1068 = vmatprep.mubr.msk.f32.mxu1 %vm1286_vm1, %v1285_v0 }
 0x2db   :  { %1062 = vmatprep.subr.mxu1 %v1285_v0 }
 0x2dc   :  { %1063 = vmatpush3.msra.mxu1 %v1332_v2 }
 0x2dd   :  { %1064 = vmatprep.subr.mxu1 %v1285_v0 }
 0x2de   :  { %1065 = vmatpush3.msra.mxu1 %v1337_v3 }
 0x2df   :  { %1066 = vmatprep.subr.mxu1 %v1285_v0 }
 0x2e0   :  { %1067 = vmatpush3.msra.mxu1 %v1343_v4 }
 0x2e1   :  { %1082 = vmatprep.subr.mxu1 %v1285_v0 }
 0x399   :  { %v240_v27 = vpop.f32.mrf.mxu1 }
 0x39a   :  { %v244_v28 = vadd.f32 %v240_v27, %v167_v26 }
 0x39b   :  { %v1048_v29 = vpop.f32.mrf.mxu1 }
 0x39c   :  { %1135 = vtanh.f32 %v244_v28  ;;  %v974_v31 = vmul.f32 -1.442695, %v244_v28 }
 0x39e   :  { %1137 = vpow2.f32 %v974_v31 }
 0x3a9   :  { %v1136_v30 = vpop.eup %1135 }
 0x3aa   :  { %254 = vrot.lane.b32.xlu1 %v1136_v30, %s1280_s15 }
 0x3ab   :  { %v1138_v32 = vpop.eup %1137 }
 0x3ac   :  { %v248_v33 = vadd.f32 1.0, %v1138_v32 }
 0x3ae   :  { %1139 = vrcp.f32 %v248_v33 }
 0x3bb   :  { %v1140_v34 = vpop.eup %1139 }
 0x3bc   :  { %v252_v37 = vmul.f32 %v1140_v34, %v153_v21  ;;  %v494_v21 = vld [vmem:[#allocation4 + $0x8] sm:$0x3] }
 0x41c   :  { %v255_v35 = vpop.permute.xlu1 %254 }
 0x41d   :  { %v257_v36 = vmul.f32 %v1140_v34, %v255_v35 }
 0x41f   :  { %259 = vrot.lane.b32.xlu0 %v257_v36, %s1280_s15 }
 0x491   :  { %v260_v38 = vpop.permute.xlu0 %259 }
 0x492   :  { %v262_v39 = vadd.f32 %v260_v38, %v252_v37 }
 0x494   :  { %1141 = vtanh.f32 %v262_v39 }
 0x4a1   :  { %v1142_v40 = vpop.eup %1141 }
 0x4a2   :  { %265 = vrot.lane.b32.xlu1 %v1142_v40, %s1280_s15 }
 0x514   :  { %v266_v41 = vpop.permute.xlu1 %265 }
 0x515   :  { %v268_v42 = vmul.f32 %v1140_v34, %v266_v41 }
 0x517   :  { %270 = vrot.lane.b32.xlu0 %v268_v42, %s1287_s0 }
 0x589   :  { %v271_v43 = vpop.permute.xlu0 %270 }
 0x58a   :  { %274 = vst.msk [vmem:[#allocation9 + $0x2] sm:$0x3] %vm47_vm0, %v271_v43  ;;  %1058 = vmatmul.mubr.msk.f32.vlgmr.msra.gmra.mxu0 %vm57_vm2, %v271_v43 }
 0x58b   :  { %1072 = vmatpush3.msra.mxu0 %v1330_v1  ;;  %1079 = vmatprep.mubr.msk.f32.mxu0 %vm1286_vm1, %v1285_v0 }
 0x58c   :  { %1073 = vmatprep.subr.mxu0 %v1285_v0 }
 0x58d   :  { %1074 = vmatpush3.msra.mxu0 %v1332_v2 }
 0x58e   :  { %1075 = vmatprep.subr.mxu0 %v1285_v0 }
 0x58f   :  { %1076 = vmatpush3.msra.mxu0 %v1337_v3 }
 0x590   :  { %1077 = vmatprep.subr.mxu0 %v1285_v0 }
 0x591   :  { %1078 = vmatpush3.msra.mxu0 %v1343_v4 }
 0x592   :  { %1093 = vmatprep.subr.mxu0 %v1285_v0 }
 0x64a   :  { %v349_v45 = vpop.f32.mrf.mxu0 }
 0x64b   :  { %v353_v46 = vadd.f32 %v349_v45, %v276_v44 }
 0x64c   :  { %v1059_v47 = vpop.f32.mrf.mxu0 }
 0x64d   :  { %1143 = vtanh.f32 %v353_v46  ;;  %v976_v49 = vmul.f32 -1.442695, %v353_v46 }
 0x64f   :  { %1145 = vpow2.f32 %v976_v49 }
 0x65a   :  { %v1144_v48 = vpop.eup %1143 }
 0x65b   :  { %363 = vrot.lane.b32.xlu1 %v1144_v48, %s1280_s15 }
 0x65c   :  { %v1146_v50 = vpop.eup %1145 }
 0x65d   :  { %v357_v51 = vadd.f32 1.0, %v1146_v50 }
 0x65f   :  { %1147 = vrcp.f32 %v357_v51 }
 0x66c   :  { %v1148_v52 = vpop.eup %1147 }
 0x66d   :  { %v361_v55 = vmul.f32 %v1148_v52, %v262_v39  ;;  %v603_v39 = vld [vmem:[#allocation4 + $0xa] sm:$0x3] }
 0x6cd   :  { %v364_v53 = vpop.permute.xlu1 %363 }
 0x6ce   :  { %v366_v54 = vmul.f32 %v1148_v52, %v364_v53 }
 0x6d0   :  { %368 = vrot.lane.b32.xlu0 %v366_v54, %s1280_s15 }
 0x742   :  { %v369_v56 = vpop.permute.xlu0 %368 }
 0x743   :  { %v371_v57 = vadd.f32 %v369_v56, %v361_v55 }
 0x745   :  { %1149 = vtanh.f32 %v371_v57 }
 0x752   :  { %v1150_v58 = vpop.eup %1149 }
 0x753   :  { %374 = vrot.lane.b32.xlu1 %v1150_v58, %s1280_s15 }
 0x7c5   :  { %v375_v59 = vpop.permute.xlu1 %374 }
 0x7c6   :  { %v377_v60 = vmul.f32 %v1148_v52, %v375_v59  ;;  %v712_v52 = vld [vmem:[#allocation4 + $0xc] sm:$0x3] }
 0x7c8   :  { %379 = vrot.lane.b32.xlu0 %v377_v60, %s1287_s0 }
 0x83a   :  { %v380_v61 = vpop.permute.xlu0 %379 }
 0x83b   :  { %383 = vst.msk [vmem:[#allocation9 + $0x4] sm:$0x3] %vm47_vm0, %v380_v61  ;;  %1069 = vmatmul.mubr.msk.f32.vlgmr.msra.gmra.mxu1 %vm57_vm2, %v380_v61 }
 0x83c   :  { %1083 = vmatpush3.msra.mxu1 %v1330_v1  ;;  %1090 = vmatprep.mubr.msk.f32.mxu1 %vm1286_vm1, %v1285_v0 }
 0x83d   :  { %1084 = vmatprep.subr.mxu1 %v1285_v0 }
 0x83e   :  { %1085 = vmatpush3.msra.mxu1 %v1332_v2 }
 0x83f   :  { %1086 = vmatprep.subr.mxu1 %v1285_v0 }
 0x840   :  { %1087 = vmatpush3.msra.mxu1 %v1337_v3 }
 0x841   :  { %1088 = vmatprep.subr.mxu1 %v1285_v0 }
 0x842   :  { %1089 = vmatpush3.msra.mxu1 %v1343_v4 }
 0x843   :  { %1104 = vmatprep.subr.mxu1 %v1285_v0 }
 0x8fb   :  { %v458_v63 = vpop.f32.mrf.mxu1 }
 0x8fc   :  { %v462_v5 = vadd.f32 %v458_v63, %v385_v62 }
 0x8fd   :  { %v1070_v6 = vpop.f32.mrf.mxu1 }
 0x8fe   :  { %1151 = vtanh.f32 %v462_v5  ;;  %v978_v8 = vmul.f32 -1.442695, %v462_v5 }
 0x900   :  { %1153 = vpow2.f32 %v978_v8 }
 0x90b   :  { %v1152_v7 = vpop.eup %1151 }
 0x90c   :  { %472 = vrot.lane.b32.xlu1 %v1152_v7, %s1280_s15 }
 0x90d   :  { %v1154_v9 = vpop.eup %1153 }
 0x90e   :  { %v466_v10 = vadd.f32 1.0, %v1154_v9 }
 0x910   :  { %1155 = vrcp.f32 %v466_v10 }
 0x91d   :  { %v1156_v11 = vpop.eup %1155 }
 0x91e   :  { %v470_v14 = vmul.f32 %v1156_v11, %v371_v57 }
 0x97e   :  { %v473_v12 = vpop.permute.xlu1 %472 }
 0x97f   :  { %v475_v13 = vmul.f32 %v1156_v11, %v473_v12 }
 0x981   :  { %477 = vrot.lane.b32.xlu0 %v475_v13, %s1280_s15 }
 0x9f3   :  { %v478_v15 = vpop.permute.xlu0 %477 }
 0x9f4   :  { %v480_v16 = vadd.f32 %v478_v15, %v470_v14 }
 0x9f6   :  { %1157 = vtanh.f32 %v480_v16 }
 0xa03   :  { %v1158_v17 = vpop.eup %1157 }
 0xa04   :  { %483 = vrot.lane.b32.xlu1 %v1158_v17, %s1280_s15 }
 0xa76   :  { %v484_v18 = vpop.permute.xlu1 %483 }
 0xa77   :  { %v486_v19 = vmul.f32 %v1156_v11, %v484_v18  ;;  %v821_v11 = vld [vmem:[#allocation4 + $0xe] sm:$0x3] }
 0xa79   :  { %488 = vrot.lane.b32.xlu0 %v486_v19, %s1287_s0 }
 0xaeb   :  { %v489_v20 = vpop.permute.xlu0 %488 }
 0xaec   :  { %492 = vst.msk [vmem:[#allocation9 + $0x6] sm:$0x3] %vm47_vm0, %v489_v20  ;;  %1080 = vmatmul.mubr.msk.f32.vlgmr.msra.gmra.mxu0 %vm57_vm2, %v489_v20 }
 0xaed   :  { %1094 = vmatpush3.msra.mxu0 %v1330_v1  ;;  %1101 = vmatprep.mubr.msk.f32.mxu0 %vm1286_vm1, %v1285_v0 }
 0xaee   :  { %1095 = vmatprep.subr.mxu0 %v1285_v0 }
 0xaef   :  { %1096 = vmatpush3.msra.mxu0 %v1332_v2 }
 0xaf0   :  { %1097 = vmatprep.subr.mxu0 %v1285_v0 }
 0xaf1   :  { %1098 = vmatpush3.msra.mxu0 %v1337_v3 }
 0xaf2   :  { %1099 = vmatprep.subr.mxu0 %v1285_v0 }
 0xaf3   :  { %1100 = vmatpush3.msra.mxu0 %v1343_v4 }
 0xbac   :  { %v567_v22 = vpop.f32.mrf.mxu0 }
 0xbad   :  { %v571_v23 = vadd.f32 %v567_v22, %v494_v21 }
 0xbae   :  { %v1081_v24 = vpop.f32.mrf.mxu0 }
 0xbaf   :  { %1159 = vtanh.f32 %v571_v23  ;;  %v980_v26 = vmul.f32 -1.442695, %v571_v23 }
 0xbb1   :  { %1161 = vpow2.f32 %v980_v26 }
 0xbbc   :  { %v1160_v25 = vpop.eup %1159 }
 0xbbd   :  { %581 = vrot.lane.b32.xlu1 %v1160_v25, %s1280_s15 }
 0xbbe   :  { %v1162_v27 = vpop.eup %1161 }
 0xbbf   :  { %v575_v28 = vadd.f32 1.0, %v1162_v27 }
 0xbc1   :  { %1163 = vrcp.f32 %v575_v28 }
 0xbce   :  { %v1164_v29 = vpop.eup %1163 }
 0xbcf   :  { %v579_v32 = vmul.f32 %v1164_v29, %v480_v16 }
 0xc2f   :  { %v582_v30 = vpop.permute.xlu1 %581 }
 0xc30   :  { %v584_v31 = vmul.f32 %v1164_v29, %v582_v30 }
 0xc32   :  { %586 = vrot.lane.b32.xlu0 %v584_v31, %s1280_s15 }
 0xca4   :  { %v587_v33 = vpop.permute.xlu0 %586 }
 0xca5   :  { %v589_v34 = vadd.f32 %v587_v33, %v579_v32 }
 0xca7   :  { %1165 = vtanh.f32 %v589_v34 }
 0xcb4   :  { %v1166_v35 = vpop.eup %1165 }
 0xcb5   :  { %592 = vrot.lane.b32.xlu1 %v1166_v35, %s1280_s15 }
 0xd27   :  { %v593_v36 = vpop.permute.xlu1 %592 }
 0xd28   :  { %v595_v37 = vmul.f32 %v1164_v29, %v593_v36 }
 0xd2a   :  { %597 = vrot.lane.b32.xlu0 %v595_v37, %s1287_s0 }
 0xd9c   :  { %v598_v38 = vpop.permute.xlu0 %597 }
 0xd9d   :  { %601 = vst.msk [vmem:[#allocation9 + $0x8] sm:$0x3] %vm47_vm0, %v598_v38  ;;  %1091 = vmatmul.mubr.msk.f32.vlgmr.msra.gmra.mxu1 %vm57_vm2, %v598_v38 }
 0xd9e   :  { %1105 = vmatpush3.msra.mxu1 %v1330_v1  ;;  %1112 = vmatprep.mubr.msk.f32.mxu1 %vm1286_vm1, %v1285_v0 }
 0xd9f   :  { %1106 = vmatprep.subr.mxu1 %v1285_v0 }
 0xda0   :  { %1107 = vmatpush3.msra.mxu1 %v1332_v2 }
 0xda1   :  { %1108 = vmatprep.subr.mxu1 %v1285_v0 }
 0xda2   :  { %1109 = vmatpush3.msra.mxu1 %v1337_v3 }
 0xda3   :  { %1110 = vmatprep.subr.mxu1 %v1285_v0 }
 0xda4   :  { %1111 = vmatpush3.msra.mxu1 %v1343_v4 }
 0xe5d   :  { %v676_v40 = vpop.f32.mrf.mxu1 }
 0xe5e   :  { %v680_v41 = vadd.f32 %v676_v40, %v603_v39 }
 0xe5f   :  { %v1092_v42 = vpop.f32.mrf.mxu1 }
 0xe60   :  { %1167 = vtanh.f32 %v680_v41  ;;  %v982_v43 = vmul.f32 -1.442695, %v680_v41 }
 0xe62   :  { %1169 = vpow2.f32 %v982_v43 }
 0xe6d   :  { %v1168_v1 = vpop.eup %1167 }
 0xe6e   :  { %690 = vrot.lane.b32.xlu1 %v1168_v1, %s1280_s15 }
 0xe6f   :  { %v1170_v44 = vpop.eup %1169 }
 0xe70   :  { %v684_v2 = vadd.f32 1.0, %v1170_v44 }
 0xe72   :  { %1171 = vrcp.f32 %v684_v2 }
 0xe7f   :  { %v1172_v45 = vpop.eup %1171 }
 0xe80   :  { %v688_v0 = vmul.f32 %v1172_v45, %v589_v34 }
 0xee0   :  { %v691_v46 = vpop.permute.xlu1 %690 }
 0xee1   :  { %v693_v3 = vmul.f32 %v1172_v45, %v691_v46 }
 0xee3   :  { %695 = vrot.lane.b32.xlu0 %v693_v3, %s1280_s15 }
 0xf55   :  { %v696_v4 = vpop.permute.xlu0 %695 }
 0xf56   :  { %v698_v47 = vadd.f32 %v696_v4, %v688_v0 }
 0xf58   :  { %1173 = vtanh.f32 %v698_v47 }
 0xf65   :  { %v1174_v48 = vpop.eup %1173 }
 0xf66   :  { %701 = vrot.lane.b32.xlu1 %v1174_v48, %s1280_s15 }
 0xfd8   :  { %v702_v49 = vpop.permute.xlu1 %701 }
 0xfd9   :  { %v704_v50 = vmul.f32 %v1172_v45, %v702_v49 }
 0xfdb   :  { %706 = vrot.lane.b32.xlu0 %v704_v50, %s1287_s0 }
0x104d   :  { %v707_v51 = vpop.permute.xlu0 %706 }
0x104e   :  { %710 = vst.msk [vmem:[#allocation9 + $0xa] sm:$0x3] %vm47_vm0, %v707_v51  ;;  %1102 = vmatmul.mubr.msk.f32.vlgmr.msra.gmra.mxu0 %vm57_vm2, %v707_v51 }
0x110e   :  { %v785_v53 = vpop.f32.mrf.mxu0 }
0x110f   :  { %v789_v54 = vadd.f32 %v785_v53, %v712_v52 }
0x1110   :  { %v1103_v55 = vpop.f32.mrf.mxu0 }
0x1111   :  { %1175 = vtanh.f32 %v789_v54  ;;  %v984_v57 = vmul.f32 -1.442695, %v789_v54 }
0x1113   :  { %1177 = vpow2.f32 %v984_v57 }
0x111e   :  { %v1176_v56 = vpop.eup %1175 }
0x111f   :  { %799 = vrot.lane.b32.xlu1 %v1176_v56, %s1280_s15 }
0x1120   :  { %v1178_v58 = vpop.eup %1177 }
0x1121   :  { %v793_v59 = vadd.f32 1.0, %v1178_v58 }
0x1123   :  { %1179 = vrcp.f32 %v793_v59 }
0x1130   :  { %v1180_v60 = vpop.eup %1179 }
0x1131   :  { %v797_v63 = vmul.f32 %v1180_v60, %v698_v47 }
0x1191   :  { %v800_v61 = vpop.permute.xlu1 %799 }
0x1192   :  { %v802_v62 = vmul.f32 %v1180_v60, %v800_v61 }
0x1194   :  { %804 = vrot.lane.b32.xlu0 %v802_v62, %s1280_s15 }
0x1206   :  { %v805_v5 = vpop.permute.xlu0 %804 }
0x1207   :  { %v807_v6 = vadd.f32 %v805_v5, %v797_v63 }
0x1209   :  { %1181 = vtanh.f32 %v807_v6 }
0x1216   :  { %v1182_v7 = vpop.eup %1181 }
0x1217   :  { %810 = vrot.lane.b32.xlu1 %v1182_v7, %s1280_s15 }
0x1289   :  { %v811_v8 = vpop.permute.xlu1 %810 }
0x128a   :  { %v813_v9 = vmul.f32 %v1180_v60, %v811_v8 }
0x128c   :  { %815 = vrot.lane.b32.xlu0 %v813_v9, %s1287_s0 }
0x12fe   :  { %v816_v10 = vpop.permute.xlu0 %815 }
0x12ff   :  { %819 = vst.msk [vmem:[#allocation9 + $0xc] sm:$0x3] %vm47_vm0, %v816_v10  ;;  %1113 = vmatmul.mubr.msk.f32.vlgmr.msra.gmra.mxu1 %vm57_vm2, %v816_v10 }
0x13bf   :  { %v894_v12 = vpop.f32.mrf.mxu1 }
0x13c0   :  { %v898_v13 = vadd.f32 %v894_v12, %v821_v11 }
0x13c1   :  { %v1114_v14 = vpop.f32.mrf.mxu1 }
0x13c2   :  { %1183 = vtanh.f32 %v898_v13  ;;  %v986_v16 = vmul.f32 -1.442695, %v898_v13 }
0x13c4   :  { %1185 = vpow2.f32 %v986_v16 }
0x13cf   :  { %v1184_v15 = vpop.eup %1183 }
0x13d0   :  { %908 = vrot.lane.b32.xlu1 %v1184_v15, %s1280_s15 }
0x13d1   :  { %v1186_v17 = vpop.eup %1185 }
0x13d2   :  { %v902_v18 = vadd.f32 1.0, %v1186_v17 }
0x13d4   :  { %1187 = vrcp.f32 %v902_v18 }
0x13e1   :  { %v1188_v19 = vpop.eup %1187 }
0x13e2   :  { %v906_v22 = vmul.f32 %v1188_v19, %v807_v6 }
0x1442   :  { %v909_v20 = vpop.permute.xlu1 %908 }
0x1443   :  { %v911_v21 = vmul.f32 %v1188_v19, %v909_v20 }
0x1445   :  { %913 = vrot.lane.b32.xlu0 %v911_v21, %s1280_s15 }
0x14b7   :  { %v914_v23 = vpop.permute.xlu0 %913 }
0x14b8   :  { %v916_v24 = vadd.f32 %v914_v23, %v906_v22 }
0x14ba   :  { %1189 = vtanh.f32 %v916_v24 }
0x14c7   :  { %v1190_v25 = vpop.eup %1189 }
0x14c8   :  { %919 = vrot.lane.b32.xlu1 %v1190_v25, %s1280_s15 }
0x14cc   :  { %931 = vrot.lane.b32.xlu1 %v916_v24, %s1288_s1 }
0x153a   :  { %v920_v26 = vpop.permute.xlu1 %919 }
0x153b   :  { %v922_v27 = vmul.f32 %v1188_v19, %v920_v26 }
0x153d   :  { %924 = vrot.lane.b32.xlu0 %v922_v27, %s1287_s0 }
0x153e   :  { %v932_v28 = vpop.permute.xlu1 %931 }
0x153f   :  { %934 = vst.msk [vmem:[#allocation3] sm:$0x3] %vm47_vm0, %v932_v28  ;;  %938 = vst.msk [vmem:[#allocation10] sm:$0x3] %vm47_vm0, %v932_v28 }
0x1540   :  { %1242 = shalt.err (!%p1239_p0)
}
0x1541   :  { %960 = dma.vmem_to_hbm [thread:$0]  %s958_s27, 32, %s1476_s3, [#allocation11]  }
0x1542   :  { %s1290_s4 = smov [#allocation9]  }
0x1543   :  { %s944_s5 = sshll.u32 %s1290_s4, 4  ;;  %s945_s5 = int_to_ptr.vmem [resolvable:$true] %s944_s5 }
0x1544   :  { %s1251_s6 = scalar_lea.vmem %s945_s5, 256  ;;  %p1256_p2 = scmp.lt.s32.totalorder %s945_s5, %s945_s5 }
0x1545   :  { %p1252_p1 = scmp.ne.s32.totalorder %s945_s5, %s1251_s6  ;;  %p1257_p3 = scmp.lt.s32.totalorder %s1251_s6, %s1251_s6 }
0x1547   :  { %p1258_p4 = por %p1257_p3, %p1256_p2 }
0x1549   :  { %p1259_p5 = pnand %p1258_p4, %p1252_p1 }
0x15af   :  { %v925_v29 = vpop.permute.xlu0 %924 }
0x15b0   :  { %928 = vst.msk [vmem:[#allocation9 + $0xe] sm:$0x3] %vm47_vm0, %v925_v29  ;;  %929 = vst.msk [vmem:[#allocation2] sm:$0x3] %vm47_vm0, %v925_v29 }
0x15b1   :  { %1262 = shalt.err (!%p1259_p5)
}
0x15b2   :  { %950 = dma.vmem_to_hbm [thread:$0]  %s945_s5, 256, %s1475_s2, [#allocation6], %s1280_s15, %s1280_s15, %s1281_s16  }
0x15b3   :  { %1275 = dma.done.wait [#allocation6], 256  }
0x15b4   :  { %1276 = vsyncadd [#allocation6], 4294967040 }
0x15b5   :  { %1277 = dma.done.wait [#allocation11], 32  }
0x15b6   :  { %1278 = vsyncadd [#allocation11], 4294967264 }
0x15b7   :  { %967 = vsyncpa [#allocation5], 1 }
0x15b8   :  { %968 = vsyncpa [#allocation8], 1 }
0x15b9   :  { %969 = vsyncpa [#allocation6], 1 }
0x15ba   :  { %970 = vsyncpa [#allocation11], 1 }

// kernel: tpu_custom_call.1
= control target key start
LH: loop header
LB: loop body
LE: loop exit
PB: predicated region body
PF: predicated region fallthrough
CT: control target
= control target key end

     0   :  { %9 = vsyncpa [#allocation5], 0  ;;  %s1473_s0 = inlined_call_operand.hbm [shape: f32[8,2,128], index: 0, kind: input, shape index: {}]   ;;  %s1474_s1 = inlined_call_operand.hbm [shape: f32[32,128], index: 1, kind: input, shape index: {}]   ;;  %s1475_s2 = inlined_call_operand.hbm [shape: f32[8,2,32], index: 2, kind: output, shape index: {0}]   ;;  %s1476_s3 = inlined_call_operand.hbm [shape: f32[2,32], index: 3, kind: output, shape index: {1}]  }
   0x1   :  { %10 = vsyncpa [#allocation8], 0 }
   0x2   :  { %11 = vsyncpa [#allocation6], 0 }
   0x3   :  { %12 = vsyncpa [#allocation11], 0  ;;  %s1279_s12 = smov [#allocation4]  }
   0x4   :  { %s18_s13 = sshll.u32 %s1279_s12, 4  ;;  %s19_s13 = int_to_ptr.vmem [resolvable:$true] %s18_s13 }
   0x5   :  { %s1199_s14 = scalar_lea.vmem %s19_s13, 256  ;;  %p1204_p1 = scmp.lt.s32.totalorder %s19_s13, %s19_s13 }
   0x6   :  { %p1200_p0 = scmp.ne.s32.totalorder %s19_s13, %s1199_s14  ;;  %p1205_p2 = scmp.lt.s32.totalorder %s1199_s14, %s1199_s14 }
   0x8   :  { %p1206_p3 = por %p1205_p2, %p1204_p1 }
   0xa   :  { %p1207_p4 = pnand %p1206_p3, %p1200_p0 }
   0xc   :  { %1210 = shalt.err (!%p1207_p4)
}
   0xd   :  { %s1280_s15 = smov 32   ;;  %s1281_s16 = smov 2  }
   0xe   :  { %24 = dma.hbm_to_vmem [thread:$0]  %s1473_s0, 256, %s19_s13, [#allocation5], %s1280_s15, %s1280_s15, %s1281_s16  }
   0xf   :  { %s1282_s19 = smov [#allocation7]  }
  0x10   :  { %s30_s20 = sshll.u32 %s1282_s19, 4  ;;  %s31_s20 = int_to_ptr.vmem [resolvable:$true] %s30_s20 }
  0x11   :  { %s1219_s21 = scalar_lea.vmem %s31_s20, 512  ;;  %p1224_p6 = scmp.lt.s32.totalorder %s31_s20, %s31_s20 }
  0x12   :  { %p1220_p5 = scmp.ne.s32.totalorder %s31_s20, %s1219_s21  ;;  %p1225_p7 = scmp.lt.s32.totalorder %s1219_s21, %s1219_s21 }
  0x14   :  { %p1226_p8 = por %p1225_p7, %p1224_p6 }
  0x16   :  { %p1227_p9 = pnand %p1226_p8, %p1220_p5 }
  0x18   :  { %1230 = shalt.err (!%p1227_p9)
}
  0x19   :  { %s1283_s22 = smov 128   ;;  %s1284_s23 = smov 8  }
  0x1a   :  { %36 = dma.hbm_to_vmem [thread:$0]  %s1474_s1, 512, %s31_s20, [#allocation8], %s1283_s22, %s1283_s22, %s1284_s23  }
  0x1b   :  { %1271 = dma.done.wait [#allocation5], 256  }
  0x1c   :  { %1272 = vsyncadd [#allocation5], 4294967040 }
  0x1d   :  { %1273 = dma.done.wait [#allocation8], 512  }
  0x1e   :  { %1274 = vsyncadd [#allocation8], 4294966784  ;;  %vm47_vm0 = vcmask 254976   ;;  %v1285_v0 = vmov 0.0   ;;  %vm1286_vm1 = vmmov 0   ;;  %v1330_v1 = vld [vmem:[#allocation7 + $0x18] sm:$0xff] }
  0x1f   :  { %1027 = vmatprep.subr.mxu0 %v1285_v0  ;;  %1035 = vmatprep.mubr.msk.f32.mxu0 %vm1286_vm1, %v1285_v0  ;;  %48 = vst.msk [vmem:[#allocation2] sm:$0x3] %vm47_vm0, %v1285_v0  ;;  %49 = vst.msk [vmem:[#allocation3] sm:$0x3] %vm47_vm0, %v1285_v0  ;;  %v1332_v2 = vld [vmem:[#allocation7 + $0x10] sm:$0xff]  ;;  %v1337_v3 = vld [vmem:[#allocation7 + $0x8] sm:$0xff] }
  0x20   :  { %1038 = vmatprep.subr.mxu1 %v1285_v0  ;;  %1046 = vmatprep.mubr.msk.f32.mxu1 %vm1286_vm1, %v1285_v0  ;;  %v1343_v4 = vld [vmem:[#allocation7] sm:$0xff]  ;;  %vm57_vm2 = vcmask 261120   ;;  %v52_v6 = vld [vmem:[#allocation4] sm:$0x3]  ;;  %s1287_s0 = smov 64   ;;  %s1288_s1 = smov 96  }
  0x21   :  { %1028 = vmatpush3.msra.mxu0 %v1330_v1  ;;  %1039 = vmatpush3.msra.mxu1 %v1330_v1  ;;  %v167_v26 = vld [vmem:[#allocation4 + $0x2] sm:$0x3]  ;;  %v276_v44 = vld [vmem:[#allocation4 + $0x4] sm:$0x3]  ;;  %v385_v62 = vld [vmem:[#allocation4 + $0x6] sm:$0x3] }
  0x22   :  { %1029 = vmatprep.subr.mxu0 %v1285_v0  ;;  %1040 = vmatprep.subr.mxu1 %v1285_v0  ;;  %s1289_s26 = smov [#allocation10]  }
  0x23   :  { %1030 = vmatpush3.msra.mxu0 %v1332_v2  ;;  %1041 = vmatpush3.msra.mxu1 %v1332_v2  ;;  %s957_s27 = sshll.u32 %s1289_s26, 4  ;;  %s958_s27 = int_to_ptr.vmem [resolvable:$true] %s957_s27 }
  0x24   :  { %1031 = vmatprep.subr.mxu0 %v1285_v0  ;;  %1042 = vmatprep.subr.mxu1 %v1285_v0  ;;  %s1231_s28 = scalar_lea.vmem %s958_s27, 32  ;;  %p1236_p11 = scmp.lt.s32.totalorder %s958_s27, %s958_s27 }
  0x25   :  { %1032 = vmatpush3.msra.mxu0 %v1337_v3  ;;  %1043 = vmatpush3.msra.mxu1 %v1337_v3  ;;  %p1232_p10 = scmp.ne.s32.totalorder %s958_s27, %s1231_s28  ;;  %p1237_p12 = scmp.lt.s32.totalorder %s1231_s28, %s1231_s28 }
  0x26   :  { %v50_v5 = vld [vmem:[#allocation2] sm:$0x3]  ;;  %1033 = vmatprep.subr.mxu0 %v1285_v0  ;;  %1044 = vmatprep.subr.mxu1 %v1285_v0  ;;  %v51_v11 = vld [vmem:[#allocation3] sm:$0x3] }
  0x27   :  { %1034 = vmatpush3.msra.mxu0 %v1343_v4  ;;  %1045 = vmatpush3.msra.mxu1 %v1343_v4  ;;  %p1238_p13 = por %p1237_p12, %p1236_p11 }
  0x28   :  { %1036 = vmatmul.mubr.msk.f32.vlgmr.msra.gmra.mxu0 %vm57_vm2, %v50_v5  ;;  %1049 = vmatprep.subr.mxu0 %v1285_v0 }
  0x29   :  { %1050 = vmatpush3.msra.mxu0 %v1330_v1  ;;  %1057 = vmatprep.mubr.msk.f32.mxu0 %vm1286_vm1, %v1285_v0  ;;  %p1239_p0 = pnand %p1238_p13, %p1232_p10 }
  0x2a   :  { %1051 = vmatprep.subr.mxu0 %v1285_v0  ;;  %1060 = vmatprep.subr.mxu1 %v1285_v0 }
  0x2b   :  { %1052 = vmatpush3.msra.mxu0 %v1332_v2 }
  0x2c   :  { %1053 = vmatprep.subr.mxu0 %v1285_v0 }
  0x2d   :  { %1054 = vmatpush3.msra.mxu0 %v1337_v3 }
  0x2e   :  { %1055 = vmatprep.subr.mxu0 %v1285_v0 }
  0x2f   :  { %1056 = vmatpush3.msra.mxu0 %v1343_v4 }
  0x30   :  { %1071 = vmatprep.subr.mxu0 %v1285_v0 }
  0xe8   :  { %v127_v7 = vpop.f32.mrf.mxu0 }
  0xe9   :  { %v131_v8 = vadd.f32 %v127_v7, %v52_v6 }
  0xea   :  { %v1037_v9 = vpop.f32.mrf.mxu0 }
  0xeb   :  { %1127 = vtanh.f32 %v131_v8  ;;  %v972_v12 = vmul.f32 -1.442695, %v131_v8 }
  0xed   :  { %1129 = vpow2.f32 %v972_v12 }
  0xf8   :  { %v1128_v10 = vpop.eup %1127 }
  0xf9   :  { %145 = vrot.lane.b32.xlu0 %v1128_v10, %s1280_s15 }
  0xfa   :  { %v1130_v13 = vpop.eup %1129 }
  0xfb   :  { %v135_v14 = vadd.f32 1.0, %v1130_v13 }
  0xfd   :  { %140 = vrot.lane.b32.xlu0 %v51_v11, %s1280_s15  ;;  %1131 = vrcp.f32 %v135_v14 }
 0x10a   :  { %v1132_v15 = vpop.eup %1131 }
 0x16b   :  { %v146_v16 = vpop.permute.xlu0 %145 }
 0x16c   :  { %v148_v17 = vmul.f32 %v1132_v15, %v146_v16 }
 0x16e   :  { %150 = vrot.lane.b32.xlu1 %v148_v17, %s1280_s15 }
 0x16f   :  { %v141_v18 = vpop.permute.xlu0 %140 }
 0x170   :  { %v143_v19 = vmul.f32 %v1132_v15, %v141_v18 }
 0x1e0   :  { %v151_v20 = vpop.permute.xlu1 %150 }
 0x1e1   :  { %v153_v21 = vadd.f32 %v151_v20, %v143_v19 }
 0x1e3   :  { %1133 = vtanh.f32 %v153_v21 }
 0x1f0   :  { %v1134_v22 = vpop.eup %1133 }
 0x1f1   :  { %156 = vrot.lane.b32.xlu1 %v1134_v22, %s1280_s15 }
 0x263   :  { %v157_v23 = vpop.permute.xlu1 %156 }
 0x264   :  { %v159_v24 = vmul.f32 %v1132_v15, %v157_v23 }
 0x266   :  { %161 = vrot.lane.b32.xlu0 %v159_v24, %s1287_s0 }
 0x2d8   :  { %v162_v25 = vpop.permute.xlu0 %161 }
 0x2d9   :  { %165 = vst.msk [vmem:[#allocation9] sm:$0x3] %vm47_vm0, %v162_v25  ;;  %1047 = vmatmul.mubr.msk.f32.vlgmr.msra.gmra.mxu1 %vm57_vm2, %v162_v25 }
 0x2da   :  { %1061 = vmatpush3.msra.mxu1 %v1330_v1  ;;  %1068 = vmatprep.mubr.msk.f32.mxu1 %vm1286_vm1, %v1285_v0 }
 0x2db   :  { %1062 = vmatprep.subr.mxu1 %v1285_v0 }
 0x2dc   :  { %1063 = vmatpush3.msra.mxu1 %v1332_v2 }
 0x2dd   :  { %1064 = vmatprep.subr.mxu1 %v1285_v0 }
 0x2de   :  { %1065 = vmatpush3.msra.mxu1 %v1337_v3 }
 0x2df   :  { %1066 = vmatprep.subr.mxu1 %v1285_v0 }
 0x2e0   :  { %1067 = vmatpush3.msra.mxu1 %v1343_v4 }
 0x2e1   :  { %1082 = vmatprep.subr.mxu1 %v1285_v0 }
 0x399   :  { %v240_v27 = vpop.f32.mrf.mxu1 }
 0x39a   :  { %v244_v28 = vadd.f32 %v240_v27, %v167_v26 }
 0x39b   :  { %v1048_v29 = vpop.f32.mrf.mxu1 }
 0x39c   :  { %1135 = vtanh.f32 %v244_v28  ;;  %v974_v31 = vmul.f32 -1.442695, %v244_v28 }
 0x39e   :  { %1137 = vpow2.f32 %v974_v31 }
 0x3a9   :  { %v1136_v30 = vpop.eup %1135 }
 0x3aa   :  { %254 = vrot.lane.b32.xlu1 %v1136_v30, %s1280_s15 }
 0x3ab   :  { %v1138_v32 = vpop.eup %1137 }
 0x3ac   :  { %v248_v33 = vadd.f32 1.0, %v1138_v32 }
 0x3ae   :  { %1139 = vrcp.f32 %v248_v33 }
 0x3bb   :  { %v1140_v34 = vpop.eup %1139 }
 0x3bc   :  { %v252_v37 = vmul.f32 %v1140_v34, %v153_v21  ;;  %v494_v21 = vld [vmem:[#allocation4 + $0x8] sm:$0x3] }
 0x41c   :  { %v255_v35 = vpop.permute.xlu1 %254 }
 0x41d   :  { %v257_v36 = vmul.f32 %v1140_v34, %v255_v35 }
 0x41f   :  { %259 = vrot.lane.b32.xlu0 %v257_v36, %s1280_s15 }
 0x491   :  { %v260_v38 = vpop.permute.xlu0 %259 }
 0x492   :  { %v262_v39 = vadd.f32 %v260_v38, %v252_v37 }
 0x494   :  { %1141 = vtanh.f32 %v262_v39 }
 0x4a1   :  { %v1142_v40 = vpop.eup %1141 }
 0x4a2   :  { %265 = vrot.lane.b32.xlu1 %v1142_v40, %s1280_s15 }
 0x514   :  { %v266_v41 = vpop.permute.xlu1 %265 }
 0x515   :  { %v268_v42 = vmul.f32 %v1140_v34, %v266_v41 }
 0x517   :  { %270 = vrot.lane.b32.xlu0 %v268_v42, %s1287_s0 }
 0x589   :  { %v271_v43 = vpop.permute.xlu0 %270 }
 0x58a   :  { %274 = vst.msk [vmem:[#allocation9 + $0x2] sm:$0x3] %vm47_vm0, %v271_v43  ;;  %1058 = vmatmul.mubr.msk.f32.vlgmr.msra.gmra.mxu0 %vm57_vm2, %v271_v43 }
 0x58b   :  { %1072 = vmatpush3.msra.mxu0 %v1330_v1  ;;  %1079 = vmatprep.mubr.msk.f32.mxu0 %vm1286_vm1, %v1285_v0 }
 0x58c   :  { %1073 = vmatprep.subr.mxu0 %v1285_v0 }
 0x58d   :  { %1074 = vmatpush3.msra.mxu0 %v1332_v2 }
 0x58e   :  { %1075 = vmatprep.subr.mxu0 %v1285_v0 }
 0x58f   :  { %1076 = vmatpush3.msra.mxu0 %v1337_v3 }
 0x590   :  { %1077 = vmatprep.subr.mxu0 %v1285_v0 }
 0x591   :  { %1078 = vmatpush3.msra.mxu0 %v1343_v4 }
 0x592   :  { %1093 = vmatprep.subr.mxu0 %v1285_v0 }
 0x64a   :  { %v349_v45 = vpop.f32.mrf.mxu0 }
 0x64b   :  { %v353_v46 = vadd.f32 %v349_v45, %v276_v44 }
 0x64c   :  { %v1059_v47 = vpop.f32.mrf.mxu0 }
 0x64d   :  { %1143 = vtanh.f32 %v353_v46  ;;  %v976_v49 = vmul.f32 -1.442695, %v353_v46 }
 0x64f   :  { %1145 = vpow2.f32 %v976_v49 }
 0x65a   :  { %v1144_v48 = vpop.eup %1143 }
 0x65b   :  { %363 = vrot.lane.b32.xlu1 %v1144_v48, %s1280_s15 }
 0x65c   :  { %v1146_v50 = vpop.eup %1145 }
 0x65d   :  { %v357_v51 = vadd.f32 1.0, %v1146_v50 }
 0x65f   :  { %1147 = vrcp.f32 %v357_v51 }
 0x66c   :  { %v1148_v52 = vpop.eup %1147 }
 0x66d   :  { %v361_v55 = vmul.f32 %v1148_v52, %v262_v39  ;;  %v603_v39 = vld [vmem:[#allocation4 + $0xa] sm:$0x3] }
 0x6cd   :  { %v364_v53 = vpop.permute.xlu1 %363 }
 0x6ce   :  { %v366_v54 = vmul.f32 %v1148_v52, %v364_v53 }
 0x6d0   :  { %368 = vrot.lane.b32.xlu0 %v366_v54, %s1280_s15 }
 0x742   :  { %v369_v56 = vpop.permute.xlu0 %368 }
 0x743   :  { %v371_v57 = vadd.f32 %v369_v56, %v361_v55 }
 0x745   :  { %1149 = vtanh.f32 %v371_v57 }
 0x752   :  { %v1150_v58 = vpop.eup %1149 }
 0x753   :  { %374 = vrot.lane.b32.xlu1 %v1150_v58, %s1280_s15 }
 0x7c5   :  { %v375_v59 = vpop.permute.xlu1 %374 }
 0x7c6   :  { %v377_v60 = vmul.f32 %v1148_v52, %v375_v59  ;;  %v712_v52 = vld [vmem:[#allocation4 + $0xc] sm:$0x3] }
 0x7c8   :  { %379 = vrot.lane.b32.xlu0 %v377_v60, %s1287_s0 }
 0x83a   :  { %v380_v61 = vpop.permute.xlu0 %379 }
 0x83b   :  { %383 = vst.msk [vmem:[#allocation9 + $0x4] sm:$0x3] %vm47_vm0, %v380_v61  ;;  %1069 = vmatmul.mubr.msk.f32.vlgmr.msra.gmra.mxu1 %vm57_vm2, %v380_v61 }
 0x83c   :  { %1083 = vmatpush3.msra.mxu1 %v1330_v1  ;;  %1090 = vmatprep.mubr.msk.f32.mxu1 %vm1286_vm1, %v1285_v0 }
 0x83d   :  { %1084 = vmatprep.subr.mxu1 %v1285_v0 }
 0x83e   :  { %1085 = vmatpush3.msra.mxu1 %v1332_v2 }
 0x83f   :  { %1086 = vmatprep.subr.mxu1 %v1285_v0 }
 0x840   :  { %1087 = vmatpush3.msra.mxu1 %v1337_v3 }
 0x841   :  { %1088 = vmatprep.subr.mxu1 %v1285_v0 }
 0x842   :  { %1089 = vmatpush3.msra.mxu1 %v1343_v4 }
 0x843   :  { %1104 = vmatprep.subr.mxu1 %v1285_v0 }
 0x8fb   :  { %v458_v63 = vpop.f32.mrf.mxu1 }
 0x8fc   :  { %v462_v5 = vadd.f32 %v458_v63, %v385_v62 }
 0x8fd   :  { %v1070_v6 = vpop.f32.mrf.mxu1 }
 0x8fe   :  { %1151 = vtanh.f32 %v462_v5  ;;  %v978_v8 = vmul.f32 -1.442695, %v462_v5 }
 0x900   :  { %1153 = vpow2.f32 %v978_v8 }
 0x90b   :  { %v1152_v7 = vpop.eup %1151 }
 0x90c   :  { %472 = vrot.lane.b32.xlu1 %v1152_v7, %s1280_s15 }
 0x90d   :  { %v1154_v9 = vpop.eup %1153 }
 0x90e   :  { %v466_v10 = vadd.f32 1.0, %v1154_v9 }
 0x910   :  { %1155 = vrcp.f32 %v466_v10 }
 0x91d   :  { %v1156_v11 = vpop.eup %1155 }
 0x91e   :  { %v470_v14 = vmul.f32 %v1156_v11, %v371_v57 }
 0x97e   :  { %v473_v12 = vpop.permute.xlu1 %472 }
 0x97f   :  { %v475_v13 = vmul.f32 %v1156_v11, %v473_v12 }
 0x981   :  { %477 = vrot.lane.b32.xlu0 %v475_v13, %s1280_s15 }
 0x9f3   :  { %v478_v15 = vpop.permute.xlu0 %477 }
 0x9f4   :  { %v480_v16 = vadd.f32 %v478_v15, %v470_v14 }
 0x9f6   :  { %1157 = vtanh.f32 %v480_v16 }
 0xa03   :  { %v1158_v17 = vpop.eup %1157 }
 0xa04   :  { %483 = vrot.lane.b32.xlu1 %v1158_v17, %s1280_s15 }
 0xa76   :  { %v484_v18 = vpop.permute.xlu1 %483 }
 0xa77   :  { %v486_v19 = vmul.f32 %v1156_v11, %v484_v18  ;;  %v821_v11 = vld [vmem:[#allocation4 + $0xe] sm:$0x3] }
 0xa79   :  { %488 = vrot.lane.b32.xlu0 %v486_v19, %s1287_s0 }
 0xaeb   :  { %v489_v20 = vpop.permute.xlu0 %488 }
 0xaec   :  { %492 = vst.msk [vmem:[#allocation9 + $0x6] sm:$0x3] %vm47_vm0, %v489_v20  ;;  %1080 = vmatmul.mubr.msk.f32.vlgmr.msra.gmra.mxu0 %vm57_vm2, %v489_v20 }
 0xaed   :  { %1094 = vmatpush3.msra.mxu0 %v1330_v1  ;;  %1101 = vmatprep.mubr.msk.f32.mxu0 %vm1286_vm1, %v1285_v0 }
 0xaee   :  { %1095 = vmatprep.subr.mxu0 %v1285_v0 }
 0xaef   :  { %1096 = vmatpush3.msra.mxu0 %v1332_v2 }
 0xaf0   :  { %1097 = vmatprep.subr.mxu0 %v1285_v0 }
 0xaf1   :  { %1098 = vmatpush3.msra.mxu0 %v1337_v3 }
 0xaf2   :  { %1099 = vmatprep.subr.mxu0 %v1285_v0 }
 0xaf3   :  { %1100 = vmatpush3.msra.mxu0 %v1343_v4 }
 0xbac   :  { %v567_v22 = vpop.f32.mrf.mxu0 }
 0xbad   :  { %v571_v23 = vadd.f32 %v567_v22, %v494_v21 }
 0xbae   :  { %v1081_v24 = vpop.f32.mrf.mxu0 }
 0xbaf   :  { %1159 = vtanh.f32 %v571_v23  ;;  %v980_v26 = vmul.f32 -1.442695, %v571_v23 }
 0xbb1   :  { %1161 = vpow2.f32 %v980_v26 }
 0xbbc   :  { %v1160_v25 = vpop.eup %1159 }
 0xbbd   :  { %581 = vrot.lane.b32.xlu1 %v1160_v25, %s1280_s15 }
 0xbbe   :  { %v1162_v27 = vpop.eup %1161 }
 0xbbf   :  { %v575_v28 = vadd.f32 1.0, %v1162_v27 }
 0xbc1   :  { %1163 = vrcp.f32 %v575_v28 }
 0xbce   :  { %v1164_v29 = vpop.eup %1163 }
 0xbcf   :  { %v579_v32 = vmul.f32 %v1164_v29, %v480_v16 }
 0xc2f   :  { %v582_v30 = vpop.permute.xlu1 %581 }
 0xc30   :  { %v584_v31 = vmul.f32 %v1164_v29, %v582_v30 }
 0xc32   :  { %586 = vrot.lane.b32.xlu0 %v584_v31, %s1280_s15 }
 0xca4   :  { %v587_v33 = vpop.permute.xlu0 %586 }
 0xca5   :  { %v589_v34 = vadd.f32 %v587_v33, %v579_v32 }
 0xca7   :  { %1165 = vtanh.f32 %v589_v34 }
 0xcb4   :  { %v1166_v35 = vpop.eup %1165 }
 0xcb5   :  { %592 = vrot.lane.b32.xlu1 %v1166_v35, %s1280_s15 }
 0xd27   :  { %v593_v36 = vpop.permute.xlu1 %592 }
 0xd28   :  { %v595_v37 = vmul.f32 %v1164_v29, %v593_v36 }
 0xd2a   :  { %597 = vrot.lane.b32.xlu0 %v595_v37, %s1287_s0 }
 0xd9c   :  { %v598_v38 = vpop.permute.xlu0 %597 }
 0xd9d   :  { %601 = vst.msk [vmem:[#allocation9 + $0x8] sm:$0x3] %vm47_vm0, %v598_v38  ;;  %1091 = vmatmul.mubr.msk.f32.vlgmr.msra.gmra.mxu1 %vm57_vm2, %v598_v38 }
 0xd9e   :  { %1105 = vmatpush3.msra.mxu1 %v1330_v1  ;;  %1112 = vmatprep.mubr.msk.f32.mxu1 %vm1286_vm1, %v1285_v0 }
 0xd9f   :  { %1106 = vmatprep.subr.mxu1 %v1285_v0 }
 0xda0   :  { %1107 = vmatpush3.msra.mxu1 %v1332_v2 }
 0xda1   :  { %1108 = vmatprep.subr.mxu1 %v1285_v0 }
 0xda2   :  { %1109 = vmatpush3.msra.mxu1 %v1337_v3 }
 0xda3   :  { %1110 = vmatprep.subr.mxu1 %v1285_v0 }
 0xda4   :  { %1111 = vmatpush3.msra.mxu1 %v1343_v4 }
 0xe5d   :  { %v676_v40 = vpop.f32.mrf.mxu1 }
 0xe5e   :  { %v680_v41 = vadd.f32 %v676_v40, %v603_v39 }
 0xe5f   :  { %v1092_v42 = vpop.f32.mrf.mxu1 }
 0xe60   :  { %1167 = vtanh.f32 %v680_v41  ;;  %v982_v43 = vmul.f32 -1.442695, %v680_v41 }
 0xe62   :  { %1169 = vpow2.f32 %v982_v43 }
 0xe6d   :  { %v1168_v1 = vpop.eup %1167 }
 0xe6e   :  { %690 = vrot.lane.b32.xlu1 %v1168_v1, %s1280_s15 }
 0xe6f   :  { %v1170_v44 = vpop.eup %1169 }
 0xe70   :  { %v684_v2 = vadd.f32 1.0, %v1170_v44 }
 0xe72   :  { %1171 = vrcp.f32 %v684_v2 }
 0xe7f   :  { %v1172_v45 = vpop.eup %1171 }
 0xe80   :  { %v688_v0 = vmul.f32 %v1172_v45, %v589_v34 }
 0xee0   :  { %v691_v46 = vpop.permute.xlu1 %690 }
 0xee1   :  { %v693_v3 = vmul.f32 %v1172_v45, %v691_v46 }
 0xee3   :  { %695 = vrot.lane.b32.xlu0 %v693_v3, %s1280_s15 }
 0xf55   :  { %v696_v4 = vpop.permute.xlu0 %695 }
 0xf56   :  { %v698_v47 = vadd.f32 %v696_v4, %v688_v0 }
 0xf58   :  { %1173 = vtanh.f32 %v698_v47 }
 0xf65   :  { %v1174_v48 = vpop.eup %1173 }
 0xf66   :  { %701 = vrot.lane.b32.xlu1 %v1174_v48, %s1280_s15 }
 0xfd8   :  { %v702_v49 = vpop.permute.xlu1 %701 }
 0xfd9   :  { %v704_v50 = vmul.f32 %v1172_v45, %v702_v49 }
 0xfdb   :  { %706 = vrot.lane.b32.xlu0 %v704_v50, %s1287_s0 }
0x104d   :  { %v707_v51 = vpop.permute.xlu0 %706 }
0x104e   :  { %710 = vst.msk [vmem:[#allocation9 + $0xa] sm:$0x3] %vm47_vm0, %v707_v51  ;;  %1102 = vmatmul.mubr.msk.f32.vlgmr.msra.gmra.mxu0 %vm57_vm2, %v707_v51 }
0x110e   :  { %v785_v53 = vpop.f32.mrf.mxu0 }
0x110f   :  { %v789_v54 = vadd.f32 %v785_v53, %v712_v52 }
0x1110   :  { %v1103_v55 = vpop.f32.mrf.mxu0 }
0x1111   :  { %1175 = vtanh.f32 %v789_v54  ;;  %v984_v57 = vmul.f32 -1.442695, %v789_v54 }
0x1113   :  { %1177 = vpow2.f32 %v984_v57 }
0x111e   :  { %v1176_v56 = vpop.eup %1175 }
0x111f   :  { %799 = vrot.lane.b32.xlu1 %v1176_v56, %s1280_s15 }
0x1120   :  { %v1178_v58 = vpop.eup %1177 }
0x1121   :  { %v793_v59 = vadd.f32 1.0, %v1178_v58 }
0x1123   :  { %1179 = vrcp.f32 %v793_v59 }
0x1130   :  { %v1180_v60 = vpop.eup %1179 }
0x1131   :  { %v797_v63 = vmul.f32 %v1180_v60, %v698_v47 }
0x1191   :  { %v800_v61 = vpop.permute.xlu1 %799 }
0x1192   :  { %v802_v62 = vmul.f32 %v1180_v60, %v800_v61 }
0x1194   :  { %804 = vrot.lane.b32.xlu0 %v802_v62, %s1280_s15 }
0x1206   :  { %v805_v5 = vpop.permute.xlu0 %804 }
0x1207   :  { %v807_v6 = vadd.f32 %v805_v5, %v797_v63 }
0x1209   :  { %1181 = vtanh.f32 %v807_v6 }
0x1216   :  { %v1182_v7 = vpop.eup %1181 }
0x1217   :  { %810 = vrot.lane.b32.xlu1 %v1182_v7, %s1280_s15 }
0x1289   :  { %v811_v8 = vpop.permute.xlu1 %810 }
0x128a   :  { %v813_v9 = vmul.f32 %v1180_v60, %v811_v8 }
0x128c   :  { %815 = vrot.lane.b32.xlu0 %v813_v9, %s1287_s0 }
0x12fe   :  { %v816_v10 = vpop.permute.xlu0 %815 }
0x12ff   :  { %819 = vst.msk [vmem:[#allocation9 + $0xc] sm:$0x3] %vm47_vm0, %v816_v10  ;;  %1113 = vmatmul.mubr.msk.f32.vlgmr.msra.gmra.mxu1 %vm57_vm2, %v816_v10 }
0x13bf   :  { %v894_v12 = vpop.f32.mrf.mxu1 }
0x13c0   :  { %v898_v13 = vadd.f32 %v894_v12, %v821_v11 }
0x13c1   :  { %v1114_v14 = vpop.f32.mrf.mxu1 }
0x13c2   :  { %1183 = vtanh.f32 %v898_v13  ;;  %v986_v16 = vmul.f32 -1.442695, %v898_v13 }
0x13c4   :  { %1185 = vpow2.f32 %v986_v16 }
0x13cf   :  { %v1184_v15 = vpop.eup %1183 }
0x13d0   :  { %908 = vrot.lane.b32.xlu1 %v1184_v15, %s1280_s15 }
0x13d1   :  { %v1186_v17 = vpop.eup %1185 }
0x13d2   :  { %v902_v18 = vadd.f32 1.0, %v1186_v17 }
0x13d4   :  { %1187 = vrcp.f32 %v902_v18 }
0x13e1   :  { %v1188_v19 = vpop.eup %1187 }
0x13e2   :  { %v906_v22 = vmul.f32 %v1188_v19, %v807_v6 }
0x1442   :  { %v909_v20 = vpop.permute.xlu1 %908 }
0x1443   :  { %v911_v21 = vmul.f32 %v1188_v19, %v909_v20 }
0x1445   :  { %913 = vrot.lane.b32.xlu0 %v911_v21, %s1280_s15 }
0x14b7   :  { %v914_v23 = vpop.permute.xlu0 %913 }
0x14b8   :  { %v916_v24 = vadd.f32 %v914_v23, %v906_v22 }
0x14ba   :  { %1189 = vtanh.f32 %v916_v24 }
0x14c7   :  { %v1190_v25 = vpop.eup %1189 }
0x14c8   :  { %919 = vrot.lane.b32.xlu1 %v1190_v25, %s1280_s15 }
0x14cc   :  { %931 = vrot.lane.b32.xlu1 %v916_v24, %s1288_s1 }
0x153a   :  { %v920_v26 = vpop.permute.xlu1 %919 }
0x153b   :  { %v922_v27 = vmul.f32 %v1188_v19, %v920_v26 }
0x153d   :  { %924 = vrot.lane.b32.xlu0 %v922_v27, %s1287_s0 }
0x153e   :  { %v932_v28 = vpop.permute.xlu1 %931 }
0x153f   :  { %934 = vst.msk [vmem:[#allocation3] sm:$0x3] %vm47_vm0, %v932_v28  ;;  %938 = vst.msk [vmem:[#allocation10] sm:$0x3] %vm47_vm0, %v932_v28 }
0x1540   :  { %1242 = shalt.err (!%p1239_p0)
}
0x1541   :  { %960 = dma.vmem_to_hbm [thread:$0]  %s958_s27, 32, %s1476_s3, [#allocation11]  }
0x1542   :  { %s1290_s4 = smov [#allocation9]  }
0x1543   :  { %s944_s5 = sshll.u32 %s1290_s4, 4  ;;  %s945_s5 = int_to_ptr.vmem [resolvable:$true] %s944_s5 }
0x1544   :  { %s1251_s6 = scalar_lea.vmem %s945_s5, 256  ;;  %p1256_p2 = scmp.lt.s32.totalorder %s945_s5, %s945_s5 }
0x1545   :  { %p1252_p1 = scmp.ne.s32.totalorder %s945_s5, %s1251_s6  ;;  %p1257_p3 = scmp.lt.s32.totalorder %s1251_s6, %s1251_s6 }
0x1547   :  { %p1258_p4 = por %p1257_p3, %p1256_p2 }
0x1549   :  { %p1259_p5 = pnand %p1258_p4, %p1252_p1 }
0x15af   :  { %v925_v29 = vpop.permute.xlu0 %924 }
0x15b0   :  { %928 = vst.msk [vmem:[#allocation9 + $0xe] sm:$0x3] %vm47_vm0, %v925_v29  ;;  %929 = vst.msk [vmem:[#allocation2] sm:$0x3] %vm47_vm0, %v925_v29 }
0x15b1   :  { %1262 = shalt.err (!%p1259_p5)
}
0x15b2   :  { %950 = dma.vmem_to_hbm [thread:$0]  %s945_s5, 256, %s1475_s2, [#allocation6], %s1280_s15, %s1280_s15, %s1281_s16  }
0x15b3   :  { %1275 = dma.done.wait [#allocation6], 256  }
0x15b4   :  { %1276 = vsyncadd [#allocation6], 4294967040 }
0x15b5   :  { %1277 = dma.done.wait [#allocation11], 32  }
0x15b6   :  { %1278 = vsyncadd [#allocation11], 4294967264 }
0x15b7   :  { %967 = vsyncpa [#allocation5], 1 }
0x15b8   :  { %968 = vsyncpa [#allocation8], 1 }
0x15b9   :  { %969 = vsyncpa [#allocation6], 1 }
0x15ba   :  { %970 = vsyncpa [#allocation11], 1 }

</bundles_post_ra>
